<compile_context>
chip_gen: v5e
topology: v5e:2x2
jax: 0.10.0
libtpu: 0.0.40
codegen_flags: <defaults>
</compile_context>

<pallas_src>
import functools

import jax
import jax.numpy as jnp
from jax.experimental import pallas as pl
from jax.experimental.pallas import tpu as pltpu


# -----------------------------------------------------------------------------
# Fused cls+reg 3x3 "same" conv head for one pyramid level.  Single grid step:
#   (1) scatter the 9 conv taps (whole batch at once) into a bf16 im2col
#       scratch, zeroing only the 1-pixel halo strips (padding=1),
#   (2) one (N*H*W, 9*Cin) @ (9*Cin, Ct) bf16 matmul with f32 accumulation,
#   (3) bias epilogue + one fused (N, H*W, Ct) store.
# -----------------------------------------------------------------------------
def _fused_head_kernel(x_ref, w_ref, b_ref, out_ref, col_ref, *, N, H, W, Cin):
    # x_ref  : (N, H, W, Cin)         activations (NHWC), f32
    # w_ref  : (9*Cin, C_cls+C_reg)   fused [cls|reg] weights, bf16
    # b_ref  : (1, C_cls+C_reg)       fused bias, f32
    # out_ref: (N, H*W, C_cls+C_reg)  fused output (permute(0,2,3,1) order)
    # col_ref: (N, H, W, 9*Cin)       bf16 im2col scratch (VMEM)
    Ct = out_ref.shape[-1]

    for kh in range(3):                       # statically unrolled taps
        for kw in range(3):
            dh, dw = kh - 1, kw - 1
            h0, h1 = max(0, -dh), H - max(0, dh)
            w0, w1 = max(0, -dw), W - max(0, dw)
            t = kh * 3 + kw
            c0, c1 = t * Cin, (t + 1) * Cin

            # Zero ONLY the halo strips this tap leaves untouched (the center
            # tap covers the whole plane, so it writes no zeros at all).
            if h0 > 0:
                col_ref[:, :h0, :, c0:c1] = jnp.zeros(
                    (N, h0, W, Cin), col_ref.dtype)
            if h1 < H:
                col_ref[:, h1:, :, c0:c1] = jnp.zeros(
                    (N, H - h1, W, Cin), col_ref.dtype)
            if w0 > 0:
                col_ref[:, h0:h1, :w0, c0:c1] = jnp.zeros(
                    (N, h1 - h0, w0, Cin), col_ref.dtype)
            if w1 < W:
                col_ref[:, h0:h1, w1:, c0:c1] = jnp.zeros(
                    (N, h1 - h0, W - w1, Cin), col_ref.dtype)

            # Shifted tap, cast to bf16 on write (no f32 scratch, no f32 temp).
            col_ref[:, h0:h1, w0:w1, c0:c1] = (
                x_ref[:, h0 + dh:h1 + dh, w0 + dw:w1 + dw, :]
                .astype(col_ref.dtype))

    # Single lane-dense matmul over the whole batch: M = N*H*W, K = 9*Cin.
    patches = col_ref[...].reshape(N * H * W, 9 * Cin)
    acc = jnp.dot(patches, w_ref[...], preferred_element_type=jnp.float32)
    acc = acc + b_ref[0]                      # f32 epilogue (v5e-friendly)

    out_ref[...] = acc.reshape(N, H * W, Ct).astype(out_ref.dtype)


def fused_box_head(x_nhwc, w_fused_bf16, b_fused):
    """Fused cls+reg 3x3 / stride 1 / pad 1 conv for one level.

    Returns the fused (N, H*W, c_cls + c_reg) slab in the permute(0, 2, 3, 1)
    channel-last ordering the PyTorch forward produces; cls/reg are split by a
    cheap slice outside the kernel.
    """
    N, H, W, Cin = x_nhwc.shape
    Ct = w_fused_bf16.shape[-1]

    kernel = functools.partial(_fused_head_kernel, N=N, H=H, W=W, Cin=Cin)
    flops = 2 * N * H * W * 9 * Cin * Ct
    bytes_accessed = (x_nhwc.size * 4 + w_fused_bf16.size * 2
                      + b_fused.size * 4 + N * H * W * Ct * 4)

    return pl.pallas_call(
        kernel,
        out_shape=jax.ShapeDtypeStruct((N, H * W, Ct), jnp.float32),
        grid_spec=pltpu.PrefetchScalarGridSpec(
            num_scalar_prefetch=0,
            grid=(1,),
            in_specs=[
                pl.BlockSpec((N, H, W, Cin), lambda i: (0, 0, 0, 0)),
                pl.BlockSpec((9 * Cin, Ct), lambda i: (0, 0)),
                pl.BlockSpec((1, Ct), lambda i: (0, 0)),
            ],
            out_specs=pl.BlockSpec((N, H * W, Ct), lambda i: (0, 0, 0)),
            scratch_shapes=[pltpu.VMEM((N, H, W, 9 * Cin), jnp.bfloat16)],
        ),
        compiler_params=pltpu.CompilerParams(
            dimension_semantics=("arbitrary",),
            vmem_limit_bytes=32 * 1024 * 1024),
        cost_estimate=pl.CostEstimate(flops=int(flops), transcendentals=0,
                                      bytes_accessed=int(bytes_accessed)),
    )(x_nhwc, w_fused_bf16, b_fused)


# -----------------------------------------------------------------------------
# Parameter init (deterministic, matches reset_parameters semantics).
# -----------------------------------------------------------------------------
def xavier_uniform_conv(key, cin, cout, kh=3, kw=3):
    fan_in = cin * kh * kw
    fan_out = cout * kh * kw
    bound = (6.0 / (fan_in + fan_out)) ** 0.5
    # stored directly in HWIO
    return jax.random.uniform(key, (kh, kw, cin, cout), jnp.float32,
                              -bound, bound)


class BoxPredictorPallas:
    """SSD BoxPredictor with 3x3-conv cls/reg headers, fused per level."""

    def __init__(self, cfg, key):
        self.cfg = cfg
        self.level_params = []   # (w_fused_bf16, b_fused, c_cls, c_reg)
        self.ref_params = []     # f32 HWIO weights, for validation
        for boxes, ch in zip(cfg["BOXES_PER_LOCATION"], cfg["OUT_CHANNELS"]):
            key, kc, kr = jax.random.split(key, 3)
            c_cls = boxes * cfg["NUM_CLASSES"]
            c_reg = boxes * 4
            wc = xavier_uniform_conv(kc, ch, c_cls)   # (3, 3, Cin, c_cls)
            wr = xavier_uniform_conv(kr, ch, c_reg)   # (3, 3, Cin, c_reg)
            bc = jnp.zeros((c_cls,), jnp.float32)
            br = jnp.zeros((c_reg,), jnp.float32)
            # Fuse the two heads along Cout, reshape to the (9*Cin, Ct) im2col
            # weight layout, store bf16 for the MXU.
            w_fused = jnp.concatenate([wc, wr], axis=-1).reshape(
                9 * ch, c_cls + c_reg)
            b_fused = jnp.concatenate([bc, br]).reshape(1, c_cls + c_reg)
            self.level_params.append(
                (w_fused.astype(jnp.bfloat16), b_fused, c_cls, c_reg))
            self.ref_params.append((wc, bc, wr, br))

    def __call__(self, features_nchw):
        cls_parts, reg_parts = [], []
        for feat, (w_fused, b_fused, c_cls, c_reg) in zip(
                features_nchw, self.level_params):
            # TODO(synk): NCHW->NHWC stays as XLA glue (see header note).
            x_nhwc = jnp.transpose(feat, (0, 2, 3, 1))
            fused = fused_box_head(x_nhwc, w_fused, b_fused)   # (N, H*W, Ct)
            cls_parts.append(fused[:, :, :c_cls])               # cheap slices
            reg_parts.append(fused[:, :, c_cls:])

        batch = features_nchw[0].shape[0]
        cls_logits = jnp.concatenate(
            [c.reshape(batch, -1) for c in cls_parts], axis=1
        ).reshape(batch, -1, self.cfg["NUM_CLASSES"])
        bbox_pred = jnp.concatenate(
            [r.reshape(batch, -1) for r in reg_parts], axis=1
        ).reshape(batch, -1, 4)
        return cls_logits, bbox_pred


# -----------------------------------------------------------------------------
# Reference conv (plain JAX) for validation — same bf16-operand / f32-accum
# path the kernel's MXU uses.
# -----------------------------------------------------------------------------
def conv3x3_ref(x_nhwc, w_hwio, bias):
    return jax.lax.conv_general_dilated(
        x_nhwc.astype(jnp.bfloat16), w_hwio.astype(jnp.bfloat16),
        window_strides=(1, 1), padding="SAME",
        dimension_numbers=("NHWC", "HWIO", "NHWC"),
        preferred_element_type=jnp.float32) + bias


if __name__ == "__main__":
    cfg = {
        "NUM_CLASSES": 4,
        "BOXES_PER_LOCATION": (2, 3),
        "OUT_CHANNELS": (8, 16),
    }
    key = jax.random.PRNGKey(0)
    kf0, kf1, kp = jax.random.split(key, 3)

    # Small NCHW feature maps (2 pyramid levels), batch = 2.
    features = [
        jax.random.normal(kf0, (2, 8, 8, 8), jnp.float32),    # (N, C0=8, 8, 8)
        jax.random.normal(kf1, (2, 16, 4, 4), jnp.float32),   # (N, C1=16, 4, 4)
    ]

    predictor = BoxPredictorPallas(cfg, kp)
    cls_logits, bbox_pred = predictor(features)
    jax.block_until_ready((cls_logits, bbox_pred))

    # Cross-check the Pallas path against lax.conv + identical glue.
    ref_cls, ref_reg = [], []
    for feat, (wc, bc, wr, br) in zip(features, predictor.ref_params):
        x_nhwc = jnp.transpose(feat, (0, 2, 3, 1))
        ref_cls.append(conv3x3_ref(x_nhwc, wc, bc))
        ref_reg.append(conv3x3_ref(x_nhwc, wr, br))
    batch = features[0].shape[0]
    ref_cls = jnp.concatenate([c.reshape(batch, -1) for c in ref_cls],
                              axis=1).reshape(batch, -1, cfg["NUM_CLASSES"])
    ref_reg = jnp.concatenate([r.reshape(batch, -1) for r in ref_reg],
                              axis=1).reshape(batch, -1, 4)

    assert cls_logits.shape == (2, 176, 4), cls_logits.shape
    assert bbox_pred.shape == (2, 176, 4), bbox_pred.shape
    assert jnp.allclose(cls_logits, ref_cls, atol=1e-2, rtol=1e-2), (
        float(jnp.max(jnp.abs(cls_logits - ref_cls))))
    assert jnp.allclose(bbox_pred, ref_reg, atol=1e-2, rtol=1e-2), (
        float(jnp.max(jnp.abs(bbox_pred - ref_reg))))

    print("KERNEL_OK")
</pallas_src>

<mosaic_0001>
module attributes {stable_mosaic.version = 11 : i64} {
  func.func @_fused_head_kernel(%arg0: i32, %arg1: memref<2x8x8x8xf32, #tpu.memory_space<vmem>>, %arg2: memref<72x16xbf16, #tpu.memory_space<vmem>>, %arg3: memref<1x16xf32, #tpu.memory_space<vmem>>, %arg4: memref<2x64x16xf32, #tpu.memory_space<vmem>>, %arg5: memref<2x8x8x72xbf16, #tpu.memory_space<vmem>>) attributes {dimension_semantics = [#tpu.dimension_semantics<arbitrary>], iteration_bounds = array<i64: 1>, scalar_prefetch = 0 : i64, scratch_operands = 1 : i64, tpu.core_type = #tpu.core_type<tc>, window_params = [{pipeline_mode = #tpu.pipeline_mode<synchronous>, transform_indices = @transform_0, window_bounds = array<i64: 2, 8, 8, 8>}, {pipeline_mode = #tpu.pipeline_mode<synchronous>, transform_indices = @transform_1, window_bounds = array<i64: 72, 16>}, {pipeline_mode = #tpu.pipeline_mode<synchronous>, transform_indices = @transform_2, window_bounds = array<i64: 1, 16>}, {pipeline_mode = #tpu.pipeline_mode<synchronous>, transform_indices = @transform_3, window_bounds = array<i64: 2, 64, 16>}]} {
    %cst = arith.constant 0.000000e+00 : bf16
    %0 = vector.broadcast %cst : bf16 to vector<2x1x8x8xbf16>
    %c0 = arith.constant 0 : index
    %c0_0 = arith.constant 0 : index
    %c0_1 = arith.constant 0 : index
    %c0_2 = arith.constant 0 : index
    %1 = vector.load %arg5[%c0, %c0_0, %c0_1, %c0_2] : memref<2x8x8x72xbf16, #tpu.memory_space<vmem>>, vector<2x1x8x8xbf16>
    tpu.vector_store %arg5[%c0, %c0_0, %c0_1, %c0_2], %0 {strides = array<i32>} : memref<2x8x8x72xbf16, #tpu.memory_space<vmem>>, vector<2x1x8x8xbf16>,
    %cst_3 = arith.constant 0.000000e+00 : bf16
    %2 = vector.broadcast %cst_3 : bf16 to vector<2x7x1x8xbf16>
    %c0_4 = arith.constant 0 : index
    %c1 = arith.constant 1 : index
    %c0_5 = arith.constant 0 : index
    %c0_6 = arith.constant 0 : index
    %3 = vector.load %arg5[%c0_4, %c1, %c0_5, %c0_6] : memref<2x8x8x72xbf16, #tpu.memory_space<vmem>>, vector<2x7x1x8xbf16>
    tpu.vector_store %arg5[%c0_4, %c1, %c0_5, %c0_6], %2 {strides = array<i32>} : memref<2x8x8x72xbf16, #tpu.memory_space<vmem>>, vector<2x7x1x8xbf16>,
    %c0_7 = arith.constant 0 : index
    %c0_8 = arith.constant 0 : index
    %c0_9 = arith.constant 0 : index
    %c0_10 = arith.constant 0 : index
    %4 = vector.load %arg1[%c0_7, %c0_8, %c0_9, %c0_10] : memref<2x8x8x8xf32, #tpu.memory_space<vmem>>, vector<2x7x7x8xf32>
    %5 = arith.truncf %4 : vector<2x7x7x8xf32> to vector<2x7x7x8xbf16>
    %c0_11 = arith.constant 0 : index
    %c1_12 = arith.constant 1 : index
    %c1_13 = arith.constant 1 : index
    %c0_14 = arith.constant 0 : index
    %6 = vector.load %arg5[%c0_11, %c1_12, %c1_13, %c0_14] : memref<2x8x8x72xbf16, #tpu.memory_space<vmem>>, vector<2x7x7x8xbf16>
    tpu.vector_store %arg5[%c0_11, %c1_12, %c1_13, %c0_14], %5 {strides = array<i32>} : memref<2x8x8x72xbf16, #tpu.memory_space<vmem>>, vector<2x7x7x8xbf16>,
    %cst_15 = arith.constant 0.000000e+00 : bf16
    %7 = vector.broadcast %cst_15 : bf16 to vector<2x1x8x8xbf16>
    %c0_16 = arith.constant 0 : index
    %c0_17 = arith.constant 0 : index
    %c0_18 = arith.constant 0 : index
    %c8 = arith.constant 8 : index
    %8 = vector.load %arg5[%c0_16, %c0_17, %c0_18, %c8] : memref<2x8x8x72xbf16, #tpu.memory_space<vmem>>, vector<2x1x8x8xbf16>
    tpu.vector_store %arg5[%c0_16, %c0_17, %c0_18, %c8], %7 {strides = array<i32>} : memref<2x8x8x72xbf16, #tpu.memory_space<vmem>>, vector<2x1x8x8xbf16>,
    %c0_19 = arith.constant 0 : index
    %c0_20 = arith.constant 0 : index
    %c0_21 = arith.constant 0 : index
    %c0_22 = arith.constant 0 : index
    %9 = vector.load %arg1[%c0_19, %c0_20, %c0_21, %c0_22] : memref<2x8x8x8xf32, #tpu.memory_space<vmem>>, vector<2x7x8x8xf32>
    %10 = arith.truncf %9 : vector<2x7x8x8xf32> to vector<2x7x8x8xbf16>
    %c0_23 = arith.constant 0 : index
    %c1_24 = arith.constant 1 : index
    %c0_25 = arith.constant 0 : index
    %c8_26 = arith.constant 8 : index
    %11 = vector.load %arg5[%c0_23, %c1_24, %c0_25, %c8_26] : memref<2x8x8x72xbf16, #tpu.memory_space<vmem>>, vector<2x7x8x8xbf16>
    tpu.vector_store %arg5[%c0_23, %c1_24, %c0_25, %c8_26], %10 {strides = array<i32>} : memref<2x8x8x72xbf16, #tpu.memory_space<vmem>>, vector<2x7x8x8xbf16>,
    %cst_27 = arith.constant 0.000000e+00 : bf16
    %12 = vector.broadcast %cst_27 : bf16 to vector<2x1x8x8xbf16>
    %c0_28 = arith.constant 0 : index
    %c0_29 = arith.constant 0 : index
    %c0_30 = arith.constant 0 : index
    %c16 = arith.constant 16 : index
    %13 = vector.load %arg5[%c0_28, %c0_29, %c0_30, %c16] : memref<2x8x8x72xbf16, #tpu.memory_space<vmem>>, vector<2x1x8x8xbf16>
    tpu.vector_store %arg5[%c0_28, %c0_29, %c0_30, %c16], %12 {strides = array<i32>} : memref<2x8x8x72xbf16, #tpu.memory_space<vmem>>, vector<2x1x8x8xbf16>,
    %cst_31 = arith.constant 0.000000e+00 : bf16
    %14 = vector.broadcast %cst_31 : bf16 to vector<2x7x1x8xbf16>
    %c0_32 = arith.constant 0 : index
    %c1_33 = arith.constant 1 : index
    %c7 = arith.constant 7 : index
    %c16_34 = arith.constant 16 : index
    %15 = vector.load %arg5[%c0_32, %c1_33, %c7, %c16_34] : memref<2x8x8x72xbf16, #tpu.memory_space<vmem>>, vector<2x7x1x8xbf16>
    tpu.vector_store %arg5[%c0_32, %c1_33, %c7, %c16_34], %14 {strides = array<i32>} : memref<2x8x8x72xbf16, #tpu.memory_space<vmem>>, vector<2x7x1x8xbf16>,
    %c0_35 = arith.constant 0 : index
    %c0_36 = arith.constant 0 : index
    %c1_37 = arith.constant 1 : index
    %c0_38 = arith.constant 0 : index
    %16 = vector.load %arg1[%c0_35, %c0_36, %c1_37, %c0_38] : memref<2x8x8x8xf32, #tpu.memory_space<vmem>>, vector<2x7x7x8xf32>
    %17 = arith.truncf %16 : vector<2x7x7x8xf32> to vector<2x7x7x8xbf16>
    %c0_39 = arith.constant 0 : index
    %c1_40 = arith.constant 1 : index
    %c0_41 = arith.constant 0 : index
    %c16_42 = arith.constant 16 : index
    %18 = vector.load %arg5[%c0_39, %c1_40, %c0_41, %c16_42] : memref<2x8x8x72xbf16, #tpu.memory_space<vmem>>, vector<2x7x7x8xbf16>
    tpu.vector_store %arg5[%c0_39, %c1_40, %c0_41, %c16_42], %17 {strides = array<i32>} : memref<2x8x8x72xbf16, #tpu.memory_space<vmem>>, vector<2x7x7x8xbf16>,
    %cst_43 = arith.constant 0.000000e+00 : bf16
    %19 = vector.broadcast %cst_43 : bf16 to vector<2x8x1x8xbf16>
    %c0_44 = arith.constant 0 : index
    %c0_45 = arith.constant 0 : index
    %c0_46 = arith.constant 0 : index
    %c24 = arith.constant 24 : index
    %20 = vector.load %arg5[%c0_44, %c0_45, %c0_46, %c24] : memref<2x8x8x72xbf16, #tpu.memory_space<vmem>>, vector<2x8x1x8xbf16>
    tpu.vector_store %arg5[%c0_44, %c0_45, %c0_46, %c24], %19 {strides = array<i32>} : memref<2x8x8x72xbf16, #tpu.memory_space<vmem>>, vector<2x8x1x8xbf16>,
    %c0_47 = arith.constant 0 : index
    %c0_48 = arith.constant 0 : index
    %c0_49 = arith.constant 0 : index
    %c0_50 = arith.constant 0 : index
    %21 = vector.load %arg1[%c0_47, %c0_48, %c0_49, %c0_50] : memref<2x8x8x8xf32, #tpu.memory_space<vmem>>, vector<2x8x7x8xf32>
    %22 = arith.truncf %21 : vector<2x8x7x8xf32> to vector<2x8x7x8xbf16>
    %c0_51 = arith.constant 0 : index
    %c0_52 = arith.constant 0 : index
    %c1_53 = arith.constant 1 : index
    %c24_54 = arith.constant 24 : index
    %23 = vector.load %arg5[%c0_51, %c0_52, %c1_53, %c24_54] : memref<2x8x8x72xbf16, #tpu.memory_space<vmem>>, vector<2x8x7x8xbf16>
    tpu.vector_store %arg5[%c0_51, %c0_52, %c1_53, %c24_54], %22 {strides = array<i32>} : memref<2x8x8x72xbf16, #tpu.memory_space<vmem>>, vector<2x8x7x8xbf16>,
    %c0_55 = arith.constant 0 : index
    %c0_56 = arith.constant 0 : index
    %c0_57 = arith.constant 0 : index
    %c0_58 = arith.constant 0 : index
    %24 = vector.load %arg1[%c0_55, %c0_56, %c0_57, %c0_58] : memref<2x8x8x8xf32, #tpu.memory_space<vmem>>, vector<2x8x8x8xf32>
    %25 = arith.truncf %24 : vector<2x8x8x8xf32> to vector<2x8x8x8xbf16>
    %c0_59 = arith.constant 0 : index
    %c0_60 = arith.constant 0 : index
    %c0_61 = arith.constant 0 : index
    %c32 = arith.constant 32 : index
    %26 = vector.load %arg5[%c0_59, %c0_60, %c0_61, %c32] : memref<2x8x8x72xbf16, #tpu.memory_space<vmem>>, vector<2x8x8x8xbf16>
    tpu.vector_store %arg5[%c0_59, %c0_60, %c0_61, %c32], %25 {strides = array<i32>} : memref<2x8x8x72xbf16, #tpu.memory_space<vmem>>, vector<2x8x8x8xbf16>,
    %cst_62 = arith.constant 0.000000e+00 : bf16
    %27 = vector.broadcast %cst_62 : bf16 to vector<2x8x1x8xbf16>
    %c0_63 = arith.constant 0 : index
    %c0_64 = arith.constant 0 : index
    %c7_65 = arith.constant 7 : index
    %c40 = arith.constant 40 : index
    %28 = vector.load %arg5[%c0_63, %c0_64, %c7_65, %c40] : memref<2x8x8x72xbf16, #tpu.memory_space<vmem>>, vector<2x8x1x8xbf16>
    tpu.vector_store %arg5[%c0_63, %c0_64, %c7_65, %c40], %27 {strides = array<i32>} : memref<2x8x8x72xbf16, #tpu.memory_space<vmem>>, vector<2x8x1x8xbf16>,
    %c0_66 = arith.constant 0 : index
    %c0_67 = arith.constant 0 : index
    %c1_68 = arith.constant 1 : index
    %c0_69 = arith.constant 0 : index
    %29 = vector.load %arg1[%c0_66, %c0_67, %c1_68, %c0_69] : memref<2x8x8x8xf32, #tpu.memory_space<vmem>>, vector<2x8x7x8xf32>
    %30 = arith.truncf %29 : vector<2x8x7x8xf32> to vector<2x8x7x8xbf16>
    %c0_70 = arith.constant 0 : index
    %c0_71 = arith.constant 0 : index
    %c0_72 = arith.constant 0 : index
    %c40_73 = arith.constant 40 : index
    %31 = vector.load %arg5[%c0_70, %c0_71, %c0_72, %c40_73] : memref<2x8x8x72xbf16, #tpu.memory_space<vmem>>, vector<2x8x7x8xbf16>
    tpu.vector_store %arg5[%c0_70, %c0_71, %c0_72, %c40_73], %30 {strides = array<i32>} : memref<2x8x8x72xbf16, #tpu.memory_space<vmem>>, vector<2x8x7x8xbf16>,
    %cst_74 = arith.constant 0.000000e+00 : bf16
    %32 = vector.broadcast %cst_74 : bf16 to vector<2x1x8x8xbf16>
    %c0_75 = arith.constant 0 : index
    %c7_76 = arith.constant 7 : index
    %c0_77 = arith.constant 0 : index
    %c48 = arith.constant 48 : index
    %33 = vector.load %arg5[%c0_75, %c7_76, %c0_77, %c48] : memref<2x8x8x72xbf16, #tpu.memory_space<vmem>>, vector<2x1x8x8xbf16>
    tpu.vector_store %arg5[%c0_75, %c7_76, %c0_77, %c48], %32 {strides = array<i32>} : memref<2x8x8x72xbf16, #tpu.memory_space<vmem>>, vector<2x1x8x8xbf16>,
    %cst_78 = arith.constant 0.000000e+00 : bf16
    %34 = vector.broadcast %cst_78 : bf16 to vector<2x7x1x8xbf16>
    %c0_79 = arith.constant 0 : index
    %c0_80 = arith.constant 0 : index
    %c0_81 = arith.constant 0 : index
    %c48_82 = arith.constant 48 : index
    %35 = vector.load %arg5[%c0_79, %c0_80, %c0_81, %c48_82] : memref<2x8x8x72xbf16, #tpu.memory_space<vmem>>, vector<2x7x1x8xbf16>
    tpu.vector_store %arg5[%c0_79, %c0_80, %c0_81, %c48_82], %34 {strides = array<i32>} : memref<2x8x8x72xbf16, #tpu.memory_space<vmem>>, vector<2x7x1x8xbf16>,
    %c0_83 = arith.constant 0 : index
    %c1_84 = arith.constant 1 : index
    %c0_85 = arith.constant 0 : index
    %c0_86 = arith.constant 0 : index
    %36 = vector.load %arg1[%c0_83, %c1_84, %c0_85, %c0_86] : memref<2x8x8x8xf32, #tpu.memory_space<vmem>>, vector<2x7x7x8xf32>
    %37 = arith.truncf %36 : vector<2x7x7x8xf32> to vector<2x7x7x8xbf16>
    %c0_87 = arith.constant 0 : index
    %c0_88 = arith.constant 0 : index
    %c1_89 = arith.constant 1 : index
    %c48_90 = arith.constant 48 : index
    %38 = vector.load %arg5[%c0_87, %c0_88, %c1_89, %c48_90] : memref<2x8x8x72xbf16, #tpu.memory_space<vmem>>, vector<2x7x7x8xbf16>
    tpu.vector_store %arg5[%c0_87, %c0_88, %c1_89, %c48_90], %37 {strides = array<i32>} : memref<2x8x8x72xbf16, #tpu.memory_space<vmem>>, vector<2x7x7x8xbf16>,
    %cst_91 = arith.constant 0.000000e+00 : bf16
    %39 = vector.broadcast %cst_91 : bf16 to vector<2x1x8x8xbf16>
    %c0_92 = arith.constant 0 : index
    %c7_93 = arith.constant 7 : index
    %c0_94 = arith.constant 0 : index
    %c56 = arith.constant 56 : index
    %40 = vector.load %arg5[%c0_92, %c7_93, %c0_94, %c56] : memref<2x8x8x72xbf16, #tpu.memory_space<vmem>>, vector<2x1x8x8xbf16>
    tpu.vector_store %arg5[%c0_92, %c7_93, %c0_94, %c56], %39 {strides = array<i32>} : memref<2x8x8x72xbf16, #tpu.memory_space<vmem>>, vector<2x1x8x8xbf16>,
    %c0_95 = arith.constant 0 : index
    %c1_96 = arith.constant 1 : index
    %c0_97 = arith.constant 0 : index
    %c0_98 = arith.constant 0 : index
    %41 = vector.load %arg1[%c0_95, %c1_96, %c0_97, %c0_98] : memref<2x8x8x8xf32, #tpu.memory_space<vmem>>, vector<2x7x8x8xf32>
    %42 = arith.truncf %41 : vector<2x7x8x8xf32> to vector<2x7x8x8xbf16>
    %c0_99 = arith.constant 0 : index
    %c0_100 = arith.constant 0 : index
    %c0_101 = arith.constant 0 : index
    %c56_102 = arith.constant 56 : index
    %43 = vector.load %arg5[%c0_99, %c0_100, %c0_101, %c56_102] : memref<2x8x8x72xbf16, #tpu.memory_space<vmem>>, vector<2x7x8x8xbf16>
    tpu.vector_store %arg5[%c0_99, %c0_100, %c0_101, %c56_102], %42 {strides = array<i32>} : memref<2x8x8x72xbf16, #tpu.memory_space<vmem>>, vector<2x7x8x8xbf16>,
    %cst_103 = arith.constant 0.000000e+00 : bf16
    %44 = vector.broadcast %cst_103 : bf16 to vector<2x1x8x8xbf16>
    %c0_104 = arith.constant 0 : index
    %c7_105 = arith.constant 7 : index
    %c0_106 = arith.constant 0 : index
    %c64 = arith.constant 64 : index
    %45 = vector.load %arg5[%c0_104, %c7_105, %c0_106, %c64] : memref<2x8x8x72xbf16, #tpu.memory_space<vmem>>, vector<2x1x8x8xbf16>
    tpu.vector_store %arg5[%c0_104, %c7_105, %c0_106, %c64], %44 {strides = array<i32>} : memref<2x8x8x72xbf16, #tpu.memory_space<vmem>>, vector<2x1x8x8xbf16>,
    %cst_107 = arith.constant 0.000000e+00 : bf16
    %46 = vector.broadcast %cst_107 : bf16 to vector<2x7x1x8xbf16>
    %c0_108 = arith.constant 0 : index
    %c0_109 = arith.constant 0 : index
    %c7_110 = arith.constant 7 : index
    %c64_111 = arith.constant 64 : index
    %47 = vector.load %arg5[%c0_108, %c0_109, %c7_110, %c64_111] : memref<2x8x8x72xbf16, #tpu.memory_space<vmem>>, vector<2x7x1x8xbf16>
    tpu.vector_store %arg5[%c0_108, %c0_109, %c7_110, %c64_111], %46 {strides = array<i32>} : memref<2x8x8x72xbf16, #tpu.memory_space<vmem>>, vector<2x7x1x8xbf16>,
    %c0_112 = arith.constant 0 : index
    %c1_113 = arith.constant 1 : index
    %c1_114 = arith.constant 1 : index
    %c0_115 = arith.constant 0 : index
    %48 = vector.load %arg1[%c0_112, %c1_113, %c1_114, %c0_115] : memref<2x8x8x8xf32, #tpu.memory_space<vmem>>, vector<2x7x7x8xf32>
    %49 = arith.truncf %48 : vector<2x7x7x8xf32> to vector<2x7x7x8xbf16>
    %c0_116 = arith.constant 0 : index
    %c0_117 = arith.constant 0 : index
    %c0_118 = arith.constant 0 : index
    %c64_119 = arith.constant 64 : index
    %50 = vector.load %arg5[%c0_116, %c0_117, %c0_118, %c64_119] : memref<2x8x8x72xbf16, #tpu.memory_space<vmem>>, vector<2x7x7x8xbf16>
    tpu.vector_store %arg5[%c0_116, %c0_117, %c0_118, %c64_119], %49 {strides = array<i32>} : memref<2x8x8x72xbf16, #tpu.memory_space<vmem>>, vector<2x7x7x8xbf16>,
    %c0_120 = arith.constant 0 : index
    %c0_121 = arith.constant 0 : index
    %c0_122 = arith.constant 0 : index
    %c0_123 = arith.constant 0 : index
    %51 = vector.load %arg5[%c0_120, %c0_121, %c0_122, %c0_123] : memref<2x8x8x72xbf16, #tpu.memory_space<vmem>>, vector<2x8x8x72xbf16>
    %52 = vector.shape_cast %51 : vector<2x8x8x72xbf16> to vector<128x72xbf16>
    %c0_124 = arith.constant 0 : index
    %c0_125 = arith.constant 0 : index
    %53 = vector.load %arg2[%c0_124, %c0_125] : memref<72x16xbf16, #tpu.memory_space<vmem>>, vector<72x16xbf16>
    %cst_126 = arith.constant dense<0.000000e+00> : vector<128x16xf32>
    %54 = tpu.matmul %52, %53, %cst_126 {dimension_numbers = #tpu.dot_dimension_numbers<[1], [0], [0], [1], [0, 0, 1, 1], [], []>} : vector<128x72xbf16>, vector<72x16xbf16>, vector<128x16xf32> -> vector<128x16xf32>
    %c0_127 = arith.constant 0 : index
    %c0_128 = arith.constant 0 : index
    %55 = vector.load %arg3[%c0_127, %c0_128] : memref<1x16xf32, #tpu.memory_space<vmem>>, vector<1x16xf32>
    %56 = vector.shape_cast %55 : vector<1x16xf32> to vector<16xf32>
    %57 = vector.shape_cast %56 : vector<16xf32> to vector<1x16xf32>
    %58 = vector.broadcast %57 : vector<1x16xf32> to vector<128x16xf32>
    %59 = arith.addf %54, %58 : vector<128x16xf32>
    %60 = vector.shape_cast %59 : vector<128x16xf32> to vector<2x64x16xf32>
    %c0_129 = arith.constant 0 : index
    %c0_130 = arith.constant 0 : index
    %c0_131 = arith.constant 0 : index
    %61 = vector.load %arg4[%c0_129, %c0_130, %c0_131] : memref<2x64x16xf32, #tpu.memory_space<vmem>>, vector<2x64x16xf32>
    tpu.vector_store %arg4[%c0_129, %c0_130, %c0_131], %60 {strides = array<i32>} : memref<2x64x16xf32, #tpu.memory_space<vmem>>, vector<2x64x16xf32>,
    return
  }
  func.func @transform_0(%arg0: i32) -> (i32, i32, i32, i32) {
    %c0_i32 = arith.constant 0 : i32
    %c0_i32_0 = arith.constant 0 : i32
    %c0_i32_1 = arith.constant 0 : i32
    %c0_i32_2 = arith.constant 0 : i32
    %c0_i32_3 = arith.constant 0 : i32
    return %c0_i32, %c0_i32_0, %c0_i32_1, %c0_i32_2 : i32, i32, i32, i32
  }
  func.func @transform_1(%arg0: i32) -> (i32, i32) {
    %c0_i32 = arith.constant 0 : i32
    %c0_i32_0 = arith.constant 0 : i32
    %c0_i32_1 = arith.constant 0 : i32
    return %c0_i32, %c0_i32_0 : i32, i32
  }
  func.func @transform_2(%arg0: i32) -> (i32, i32) {
    %c0_i32 = arith.constant 0 : i32
    %c0_i32_0 = arith.constant 0 : i32
    %c0_i32_1 = arith.constant 0 : i32
    return %c0_i32, %c0_i32_0 : i32, i32
  }
  func.func @transform_3(%arg0: i32) -> (i32, i32, i32) {
    %c0_i32 = arith.constant 0 : i32
    %c0_i32_0 = arith.constant 0 : i32
    %c0_i32_1 = arith.constant 0 : i32
    %c0_i32_2 = arith.constant 0 : i32
    return %c0_i32, %c0_i32_0, %c0_i32_1 : i32, i32, i32
  }
}

</mosaic_0001>

<bundles_post_ra>
// kernel: tpu_custom_call.1
= control target key start
LH: loop header
LB: loop body
LE: loop exit
PB: predicated region body
PF: predicated region fallthrough
CT: control target
= control target key end

     0   :  { %8 = vsyncpa [#allocation4], 0  ;;  %s1998_s15 = smov [#allocation3]   ;;  %s1999_s17 = smov 128   ;;  %s2807_s0 = inlined_call_operand.hbm [shape: f32[2,8,8,8], index: 0, kind: input, shape index: {}]   ;;  %s2808_s1 = inlined_call_operand.vmem [shape: bf16[72,16], index: 1, kind: input, shape index: {}]   ;;  %s2809_s2 = inlined_call_operand.vmem [shape: f32[1,16], index: 2, kind: input, shape index: {}]   ;;  %s2810_s3 = inlined_call_operand.vmem [shape: f32[2,64,16], index: 3, kind: output, shape index: {}]  }
   0x1   :  { %s13_s14 = sshll.u32 %s2807_s0, 4  ;;  %s15_s16 = sshll.u32 %s1998_s15, 4  ;;  %s14_s14 = int_to_ptr.hbm [resolvable:$true] %s13_s14  ;;  %s16_s16 = int_to_ptr.vmem [resolvable:$true] %s15_s16 }
   0x2   :  { %s2000_s18 = smov 8  }
   0x3   :  { %21 = dma.hbm_to_vmem [thread:$0]  %s14_s14, 2048, %s16_s16, [#allocation4], %s1999_s17, %s1999_s17, %s2000_s18  }
   0x4   :  { %1996 = dma.done.wait [#allocation4], 2048  }
   0x5   :  { %1997 = vsyncadd [#allocation4], 4294965248  ;;  %v272_v0 = vld [vmem:[#allocation3 + $0x20] sm:$0xff]  ;;  %v270_v1 = vld [vmem:[#allocation3 + $0x10] sm:$0xff]  ;;  %s2001_s0 = smov 16   ;;  %vm35_vm0 = vcmask 57344  }
   0x6   :  { %v268_v2 = vld [vmem:[#allocation3] sm:$0xff]  ;;  %v2033_v3 = vpack.c.bf16 %v272_v0, %v272_v0  ;;  %v284_v4 = vpack.c.bf16 %v270_v1, %v270_v1  ;;  %v273_v6 = vld [vmem:[#allocation3 + $0x28] sm:$0xff]  ;;  %v271_v7 = vld [vmem:[#allocation3 + $0x18] sm:$0xff]  ;;  %vm36_vm1 = vsmask.f32 256  ;;  %vm31_vm3 = vcmask 60416  }
   0x7   :  { %v2035_v5 = vpack.c.bf16 %v268_v2, %v268_v2  ;;  %v269_v8 = vld [vmem:[#allocation3 + $0x8] sm:$0xff]  ;;  %v2042_v9 = vpack.c.bf16 %v273_v6, %v273_v6  ;;  %v2044_v10 = vpack.c.bf16 %v271_v7, %v271_v7  ;;  %v275_v13 = vld [vmem:[#allocation3 + $0x40] sm:$0xff]  ;;  %v274_v14 = vld [vmem:[#allocation3 + $0x30] sm:$0xff]  ;;  %vm221_vm4 = vsmask.f32 7938  ;;  %s2002_s19 = smov 24  }
   0x8   :  { %318 = vrot.lane.b32.xlu2 %v2033_v3, %s2000_s18  ;;  %314 = vrot.lane.b32.xlu1 %v284_v4, %s2000_s18  ;;  %v2046_v11 = vpack.c.bf16 %v269_v8, %v269_v8  ;;  %v276_v12 = vld [vmem:[#allocation3 + $0x48] sm:$0xff]  ;;  %v2056_v16 = vpack.c.bf16 %v275_v13, %v275_v13  ;;  %v2058_v17 = vpack.c.bf16 %v274_v14, %v274_v14  ;;  %v279_v18 = vld [vmem:[#allocation3 + $0x60] sm:$0xff]  ;;  %v278_v19 = vld [vmem:[#allocation3 + $0x58] sm:$0xff]  ;;  %vm265_vm6 = vcmask 126016   ;;  %s2003_s20 = smov 32   ;;  %s2004_s21 = smov 40  }
   0x9   :  { %310 = vrot.lane.b32.xlu0 %v2035_v5, %s2000_s18  ;;  %v2054_v15 = vpack.c.bf16 %v276_v12, %v276_v12  ;;  %v277_v20 = vld [vmem:[#allocation3 + $0x50] sm:$0xff]  ;;  %v2066_v21 = vpack.c.bf16 %v279_v18, %v279_v18  ;;  %v2068_v22 = vpack.c.bf16 %v278_v19, %v278_v19  ;;  %v414_v24 = vld [vmem:[#allocation3 + $0x1] sm:$0x7f]  ;;  %v280_v26 = vld [vmem:[#allocation3 + $0x68] sm:$0xff]  ;;  %vm370_vm7 = vsmask.f32 7950 }
   0xa   :  { %v2070_v23 = vpack.c.bf16 %v277_v20, %v277_v20  ;;  %v281_v25 = vld [vmem:[#allocation3 + $0x70] sm:$0xff]  ;;  %v428_v27 = vpack.c.bf16 %v414_v24, %v414_v24  ;;  %v2080_v29 = vpack.c.bf16 %v280_v26, %v280_v26  ;;  %v417_v30 = vld [vmem:[#allocation3 + $0x19] sm:$0x7f]  ;;  %v415_v32 = vld [vmem:[#allocation3 + $0x9] sm:$0x7f]  ;;  %vm369_vm8 = vcmask 191619  }
   0xb   :  { %v2078_v28 = vpack.c.bf16 %v281_v25, %v281_v25  ;;  %v416_v31 = vld [vmem:[#allocation3 + $0x11] sm:$0x7f]  ;;  %v431_v33 = vpack.c.bf16 %v417_v30, %v417_v30  ;;  %v429_v35 = vpack.c.bf16 %v415_v32, %v415_v32  ;;  %v419_v37 = vld [vmem:[#allocation3 + $0x29] sm:$0x7f]  ;;  %v418_v38 = vld [vmem:[#allocation3 + $0x21] sm:$0x7f] }
   0xc   :  { %v430_v34 = vpack.c.bf16 %v416_v31, %v416_v31  ;;  %v420_v36 = vld [vmem:[#allocation3 + $0x31] sm:$0x7f]  ;;  %v433_v40 = vpack.c.bf16 %v419_v37, %v419_v37  ;;  %v432_v41 = vpack.c.bf16 %v418_v38, %v418_v38  ;;  %v422_v43 = vld [vmem:[#allocation3 + $0x49] sm:$0x7f]  ;;  %v421_v44 = vld [vmem:[#allocation3 + $0x41] sm:$0x7f] }
   0xd   :  { %v434_v39 = vpack.c.bf16 %v420_v36, %v420_v36  ;;  %v423_v42 = vld [vmem:[#allocation3 + $0x51] sm:$0x7f]  ;;  %v436_v46 = vpack.c.bf16 %v422_v43, %v422_v43  ;;  %v594_v47 = vld [vmem:[#allocation3 + $0x8] sm:$0x7f]  ;;  %v593_v48 = vld [vmem:[#allocation3] sm:$0x7f]  ;;  %v435_v49 = vpack.c.bf16 %v421_v44, %v421_v44 }
   0xe   :  { %v437_v45 = vpack.c.bf16 %v423_v42, %v423_v42  ;;  %v610_v50 = vpack.c.bf16 %v594_v47, %v594_v47  ;;  %v609_v51 = vpack.c.bf16 %v593_v48, %v593_v48  ;;  %v426_v52 = vld [vmem:[#allocation3 + $0x69] sm:$0x7f]  ;;  %v425_v53 = vld [vmem:[#allocation3 + $0x61] sm:$0x7f]  ;;  %v424_v54 = vld [vmem:[#allocation3 + $0x59] sm:$0x7f] }
   0xf   :  { %vm2097_vm2 = vmand %vm35_vm0, %vm36_vm1  ;;  %v50_v56 = vld [vmem:[#allocation2 + $0x14] sm:$0x1]  ;;  %v84_v60 = vld [vmem:[#allocation3 + $0x20] sm:$0x7f]  ;;  %v440_v61 = vpack.c.bf16 %v426_v52, %v426_v52  ;;  %v439_v62 = vpack.c.bf16 %v425_v53, %v425_v53  ;;  %v438_v2 = vpack.c.bf16 %v424_v54, %v424_v54  ;;  %vm366_vm10 = vcmask 191616   ;;  %s2006_s22 = smov 48  }
  0x10   :  { %320 = vrot.lane.b32.xlu2 %v2042_v9, %s2000_s18  ;;  %316 = vrot.lane.b32.xlu1 %v2044_v10, %s2000_s18  ;;  %v633_v57 = vshrl.u32 %v610_v50, 16  ;;  %v626_v58 = vshrl.u32 %v609_v51, 16  ;;  %v51_v59 = vsel %vm2097_vm2, 0, %v50_v56  ;;  %v605_v63 = vld [vmem:[#allocation3 + $0x60] sm:$0x7f]  ;;  %v98_v1 = vpack.c.bf16 %v84_v60, %v84_v60  ;;  %vm2108_vm5 = vmand %vm31_vm3, %vm221_vm4  ;;  %s2007_s23 = smov 56  }
  0x11   :  { %312 = vrot.lane.b32.xlu0 %v2046_v11, %s2000_s18  ;;  %v602_v0 = vld [vmem:[#allocation3 + $0x48] sm:$0x7f]  ;;  %52 = vst [vmem:[#allocation2 + $0x14] sm:$0x1] %v51_v59  ;;  %v601_v4 = vld [vmem:[#allocation3 + $0x40] sm:$0x7f]  ;;  %v621_v13 = vpack.c.bf16 %v605_v63, %v605_v63  ;;  %vm2159_vm9 = vmand %vm369_vm8, %vm370_vm7 }
  0x12   :  { %v137_v6 = vshrl.u32 %v98_v1, 16  ;;  %v140_v7 = vshll.u32 %v98_v1, 16  ;;  %v635_v8 = vrot.slane %v633_v57, 7  ;;  %v636_v12 = vshll.u32 %v610_v50, 16  ;;  %v427_v26 = vld [vmem:[#allocation3 + $0x71] sm:$0x7f] }
  0x13   :  { %v618_v14 = vpack.c.bf16 %v602_v0, %v602_v0  ;;  %v628_v18 = vrot.slane %v626_v58, 7  ;;  %v629_v19 = vshll.u32 %v609_v51, 16  ;;  %v617_v20 = vpack.c.bf16 %v601_v4, %v601_v4  ;;  %v53_v37 = vld [vmem:[#allocation2 + $0x18] sm:$0x1]  ;;  %v85_v38 = vld [vmem:[#allocation3 + $0x28] sm:$0x7f] }
  0x14   :  { %v139_v24 = vrot.slane %v137_v6, 7  ;;  %v710_v30 = vshrl.u32 %v621_v13, 16  ;;  %v99_v42 = vpack.c.bf16 %v85_v38, %v85_v38  ;;  %v713_v43 = vshll.u32 %v621_v13, 16  ;;  %v44_v52 = vld [vmem:[#allocation2 + $0xc] sm:$0x1]  ;;  %s2008_s24 = smov 64  }
  0x15   :  { %v689_v31 = vshrl.u32 %v618_v14, 16  ;;  %v692_v48 = vshll.u32 %v618_v14, 16  ;;  %v685_v50 = vshll.u32 %v617_v20, 16  ;;  %v45_v54 = vsel %vm2097_vm2, 0, %v44_v52  ;;  %v82_v56 = vld [vmem:[#allocation3 + $0x10] sm:$0x7f] }
  0x16   :  { %v712_v44 = vrot.slane %v710_v30, 7  ;;  %v147_v47 = vshll.u32 %v99_v42, 16  ;;  %v38_v57 = vld [vmem:[#allocation2 + $0x4] sm:$0x1]  ;;  %46 = vst [vmem:[#allocation2 + $0xc] sm:$0x1] %v45_v54  ;;  %v96_v58 = vpack.c.bf16 %v82_v56, %v82_v56 }
  0x17   :  { %v39_v59 = vsel %vm2097_vm2, 0, %v38_v57  ;;  %v80_v60 = vld [vmem:[#allocation3] sm:$0x7f]  ;;  %v88_v4 = vld [vmem:[#allocation3 + $0x48] sm:$0x7f]  ;;  %vm543_vm13 = vcmask 254144  }
  0x18   :  { %326 = vrot.lane.b32.xlu2 %v2054_v15, %s2000_s18  ;;  %324 = vrot.lane.b32.xlu1 %v2056_v16, %s2000_s18  ;;  %v235_v32 = vld [vmem:[#allocation2 + $0x14] sm:$0xf]  ;;  %40 = vst [vmem:[#allocation2 + $0x4] sm:$0x1] %v39_v59  ;;  %v715_v63 = vor.u32 %v713_v43, %v712_v44  ;;  %v123_v6 = vshrl.u32 %v96_v58, 16  ;;  %v102_v14 = vpack.c.bf16 %v88_v4, %v88_v4  ;;  %vm2254_vm14 = vmand %vm543_vm13, %vm36_vm1  ;;  %vm785_vm15 = vcmask 257216  }
  0x19   :  { %322 = vrot.lane.b32.xlu0 %v2058_v17, %s2000_s18  ;;  %v47_v43 = vld [vmem:[#allocation2 + $0x10] sm:$0x1]  ;;  %v83_v44 = vld [vmem:[#allocation3 + $0x18] sm:$0x7f]  ;;  %v41_v59 = vld [vmem:[#allocation2 + $0x8] sm:$0x1] }
  0x1a   :  { %v48_v56 = vsel %vm2097_vm2, 0, %v47_v43  ;;  %vm499_vm11 = vsmask.f32 3328  ;;  %v1011_v25 = vld [vmem:[#allocation3 + $0x69] sm:$0x7f]  ;;  %vm2307_vm0 = vmand %vm785_vm15, %vm221_vm4  ;;  %vm1509_vm13 = vcmask 585219  }
  0x1b   :  { %49 = vst [vmem:[#allocation2 + $0x10] sm:$0x1] %v48_v56  ;;  %vm2236_vm12 = vmand %vm366_vm10, %vm499_vm11  ;;  %vm1802_vm15 = vcmask 1043456  }
  0x1d   :  { %v229_v38 = vld [vmem:[#allocation2 + $0xc] sm:$0xf] }
  0x20   :  { %332 = vrot.lane.b32.xlu2 %v2066_v21, %s2000_s18  ;;  %330 = vrot.lane.b32.xlu1 %v2068_v22, %s2000_s18 }
  0x21   :  { %328 = vrot.lane.b32.xlu0 %v2070_v23, %s2000_s18 }
  0x28   :  { %456 = vrot.lane.b32.xlu2 %v428_v27, %s2001_s0  ;;  %336 = vrot.lane.b32.xlu1 %v2078_v28, %s2000_s18  ;;  %v142_v27 = vor.u32 %v140_v7, %v139_v24 }
  0x29   :  { %334 = vrot.lane.b32.xlu0 %v2080_v29, %s2000_s18 }
  0x2a   :  { %v236_v36 = vsel %vm2108_vm5, %v142_v27, %v235_v32  ;;  %v168_v27 = vshll.u32 %v102_v14, 16 }
  0x2b   :  { %237 = vst [vmem:[#allocation2 + $0x14] sm:$0xf] %v236_v36  ;;  %v598_v36 = vld [vmem:[#allocation3 + $0x28] sm:$0x7f] }
  0x30   :  { %462 = vrot.lane.b32.xlu2 %v431_v33, %s2001_s0  ;;  %460 = vrot.lane.b32.xlu1 %v430_v34, %s2001_s0  ;;  %v638_v33 = vor.u32 %v636_v12, %v635_v8  ;;  %v631_v34 = vor.u32 %v629_v19, %v628_v18  ;;  %v597_v8 = vld [vmem:[#allocation3 + $0x20] sm:$0x7f]  ;;  %v125_v19 = vrot.slane %v123_v6, 7  ;;  %v42_v6 = vsel %vm2097_vm2, 0, %v41_v59  ;;  %v604_v59 = vld [vmem:[#allocation3 + $0x58] sm:$0x7f] }
  0x31   :  { %458 = vrot.lane.b32.xlu0 %v429_v35, %s2001_s0  ;;  %v682_v35 = vshrl.u32 %v617_v20, 16  ;;  %v126_v20 = vshll.u32 %v96_v58, 16  ;;  %v613_v32 = vpack.c.bf16 %v597_v8, %v597_v8  ;;  %43 = vst [vmem:[#allocation2 + $0x8] sm:$0x1] %v42_v6 }
  0x38   :  { %468 = vrot.lane.b32.xlu2 %v434_v39, %s2001_s0  ;;  %466 = vrot.lane.b32.xlu1 %v433_v40, %s2001_s0  ;;  %v441_v39 = vpack.c.bf16 %v427_v26, %v427_v26  ;;  %v606_v40 = vld [vmem:[#allocation3 + $0x68] sm:$0x7f]  ;;  %v165_v26 = vshrl.u32 %v102_v14, 16 }
  0x39   :  { %464 = vrot.lane.b32.xlu0 %v432_v41, %s2001_s0  ;;  %v54_v41 = vsel %vm2097_vm2, 0, %v53_v37  ;;  %v622_v51 = vpack.c.bf16 %v606_v40, %v606_v40 }
  0x3a   :  { %55 = vst [vmem:[#allocation2 + $0x18] sm:$0x1] %v54_v41  ;;  %v167_v37 = vrot.slane %v165_v26, 7  ;;  %v223_v41 = vld [vmem:[#allocation2 + $0x4] sm:$0xf] }
  0x3b   :  { %v717_v1 = vshrl.u32 %v622_v51, 16 }
  0x40   :  { %474 = vrot.lane.b32.xlu2 %v437_v45, %s2001_s0  ;;  %472 = vrot.lane.b32.xlu1 %v436_v46, %s2001_s0  ;;  %v691_v45 = vrot.slane %v689_v31, 7  ;;  %v144_v46 = vshrl.u32 %v99_v42, 16  ;;  %v719_v31 = vrot.slane %v717_v1, 7  ;;  %v170_v42 = vor.u32 %v168_v27, %v167_v37 }
  0x41   :  { %470 = vrot.lane.b32.xlu0 %v435_v49, %s2001_s0  ;;  %v684_v49 = vrot.slane %v682_v35, 7  ;;  %v238_v12 = vld [vmem:[#allocation2 + $0x18] sm:$0xf]  ;;  %v720_v35 = vshll.u32 %v622_v51, 16 }
  0x42   :  { %v146_v53 = vrot.slane %v144_v46, 7  ;;  %v694_v0 = vor.u32 %v692_v48, %v691_v45  ;;  %v654_v45 = vshrl.u32 %v613_v32, 16  ;;  %v2132_v46 = vpack.c.bf16 %v598_v36, %v598_v36  ;;  %v91_v48 = vld [vmem:[#allocation3 + $0x60] sm:$0x7f] }
  0x43   :  { %v687_v7 = vor.u32 %v685_v50, %v684_v49  ;;  %v97_v50 = vpack.c.bf16 %v83_v44, %v83_v44  ;;  %v722_v51 = vor.u32 %v720_v35, %v719_v31  ;;  %v105_v54 = vpack.c.bf16 %v91_v48, %v91_v48  ;;  %v603_v31 = vld [vmem:[#allocation3 + $0x50] sm:$0x7f]  ;;  %v226_v48 = vld [vmem:[#allocation2 + $0x8] sm:$0xf] }
  0x45   :  { %v130_v58 = vshrl.u32 %v97_v50, 16  ;;  %v133_v4 = vshll.u32 %v97_v50, 16 }
  0x48   :  { %480 = vrot.lane.b32.xlu2 %v440_v61, %s2001_s0  ;;  %478 = vrot.lane.b32.xlu1 %v439_v62, %s2001_s0  ;;  %v149_v61 = vor.u32 %v147_v47, %v146_v53  ;;  %v94_v62 = vpack.c.bf16 %v80_v60, %v80_v60  ;;  %v71_v47 = vld [vmem:[#allocation2 + $0x34] sm:$0x1]  ;;  %v186_v60 = vshrl.u32 %v105_v54, 16 }
  0x49   :  { %476 = vrot.lane.b32.xlu0 %v438_v2, %s2001_s0  ;;  %v62_v2 = vld [vmem:[#allocation2 + $0x28] sm:$0x1]  ;;  %v72_v53 = vsel %vm2097_vm2, 0, %v71_v47 }
  0x4a   :  { %v63_v13 = vsel %vm2097_vm2, 0, %v62_v2  ;;  %v239_v18 = vsel %vm2108_vm5, %v149_v61, %v238_v12  ;;  %v109_v24 = vshrl.u32 %v94_v62, 16  ;;  %v112_v30 = vshll.u32 %v94_v62, 16  ;;  %73 = vst [vmem:[#allocation2 + $0x34] sm:$0x1] %v72_v53 }
  0x4b   :  { %64 = vst [vmem:[#allocation2 + $0x28] sm:$0x1] %v63_v13  ;;  %v189_v61 = vshll.u32 %v105_v54, 16  ;;  %v656_v62 = vrot.slane %v654_v45, 7  ;;  %v188_v1 = vrot.slane %v186_v60, 7  ;;  %v132_v2 = vrot.slane %v130_v58, 7 }
  0x4c   :  { %240 = vst [vmem:[#allocation2 + $0x18] sm:$0xf] %v239_v18  ;;  %v59_v12 = vld [vmem:[#allocation2 + $0x24] sm:$0x1]  ;;  %v664_v45 = vshll.u32 %v2132_v46, 16 }
  0x4d   :  { %v191_v13 = vor.u32 %v189_v61, %v188_v1  ;;  %v60_v14 = vsel %vm2097_vm2, 0, %v59_v12  ;;  %v87_v18 = vld [vmem:[#allocation3 + $0x40] sm:$0x7f]  ;;  %v68_v54 = vld [vmem:[#allocation2 + $0x30] sm:$0x1] }
  0x4e   :  { %61 = vst [vmem:[#allocation2 + $0x24] sm:$0x1] %v60_v14  ;;  %v101_v27 = vpack.c.bf16 %v87_v18, %v87_v18  ;;  %v90_v1 = vld [vmem:[#allocation3 + $0x58] sm:$0x7f]  ;;  %v620_v14 = vpack.c.bf16 %v604_v59, %v604_v59 }
  0x50   :  { %739 = vrot.lane.b32.xlu2 %v638_v33, %s2002_s19  ;;  %737 = vrot.lane.b32.xlu1 %v631_v34, %s2002_s19  ;;  %v128_v33 = vor.u32 %v126_v20, %v125_v19  ;;  %v111_v34 = vrot.slane %v109_v24, 7  ;;  %v158_v37 = vshrl.u32 %v101_v27, 16  ;;  %v161_v44 = vshll.u32 %v101_v27, 16 }
  0x51   :  { %482 = vrot.lane.b32.xlu0 %v441_v39, %s2001_s0 }
  0x52   :  { %v230_v39 = vsel %vm2108_vm5, %v128_v33, %v229_v38  ;;  %v114_v40 = vor.u32 %v112_v30, %v111_v34  ;;  %v247_v52 = vld [vmem:[#allocation2 + $0x28] sm:$0xf]  ;;  %v86_v30 = vld [vmem:[#allocation3 + $0x30] sm:$0x7f]  ;;  %v135_v33 = vor.u32 %v133_v4, %v132_v2  ;;  %v160_v43 = vrot.slane %v158_v37, 7 }
  0x53   :  { %231 = vst [vmem:[#allocation2 + $0xc] sm:$0xf] %v230_v39  ;;  %v248_v57 = vsel %vm2108_vm5, %v170_v42, %v247_v52  ;;  %v100_v34 = vpack.c.bf16 %v86_v30, %v86_v30  ;;  %v65_v2 = vld [vmem:[#allocation2 + $0x2c] sm:$0x1]  ;;  %v104_v4 = vpack.c.bf16 %v90_v1, %v90_v1  ;;  %v1006_v1 = vld [vmem:[#allocation3 + $0x41] sm:$0x7f] }
  0x54   :  { %v224_v49 = vsel %vm2108_vm5, %v114_v40, %v223_v41  ;;  %249 = vst [vmem:[#allocation2 + $0x28] sm:$0xf] %v248_v57  ;;  %v619_v40 = vpack.c.bf16 %v603_v31, %v603_v31  ;;  %v232_v41 = vld [vmem:[#allocation2 + $0x10] sm:$0xf]  ;;  %v163_v53 = vor.u32 %v161_v44, %v160_v43  ;;  %v66_v6 = vsel %vm2097_vm2, 0, %v65_v2 }
  0x55   :  { %225 = vst [vmem:[#allocation2 + $0x4] sm:$0xf] %v224_v49  ;;  %v233_v47 = vsel %vm2108_vm5, %v135_v33, %v232_v41  ;;  %v151_v49 = vshrl.u32 %v100_v34, 16  ;;  %v154_v50 = vshll.u32 %v100_v34, 16  ;;  %v179_v18 = vshrl.u32 %v104_v4, 16 }
  0x56   :  { %234 = vst [vmem:[#allocation2 + $0x10] sm:$0xf] %v233_v47  ;;  %v696_v58 = vshrl.u32 %v619_v40, 16  ;;  %v703_v33 = vshrl.u32 %v620_v14, 16  ;;  %v74_v41 = vld [vmem:[#allocation2 + $0x38] sm:$0x1] }
  0x57   :  { %v153_v57 = vrot.slane %v151_v49, 7  ;;  %67 = vst [vmem:[#allocation2 + $0x2c] sm:$0x1] %v66_v6  ;;  %v75_v44 = vsel %vm2097_vm2, 0, %v74_v41 }
  0x58   :  { %761 = vrot.lane.b32.xlu2 %v715_v63, %s2002_s19  ;;  %755 = vrot.lane.b32.xlu1 %v694_v0, %s2002_s19  ;;  %v657_v63 = vshll.u32 %v613_v32, 16  ;;  %v661_v0 = vshrl.u32 %v2132_v46, 16  ;;  %v256_v32 = vld [vmem:[#allocation2 + $0x34] sm:$0xf]  ;;  %v244_v46 = vld [vmem:[#allocation2 + $0x24] sm:$0xf] }
  0x59   :  { %753 = vrot.lane.b32.xlu0 %v687_v7, %s2002_s19  ;;  %v81_v7 = vld [vmem:[#allocation3 + $0x8] sm:$0x7f]  ;;  %v257_v35 = vsel %vm2108_vm5, %v191_v13, %v256_v32  ;;  %v245_v60 = vsel %vm2108_vm5, %v163_v53, %v244_v46  ;;  %v698_v12 = vrot.slane %v696_v58, 7  ;;  %76 = vst [vmem:[#allocation2 + $0x38] sm:$0x1] %v75_v44 }
  0x5a   :  { %v659_v20 = vor.u32 %v657_v63, %v656_v62  ;;  %v663_v38 = vrot.slane %v661_v0, 7  ;;  %258 = vst [vmem:[#allocation2 + $0x34] sm:$0xf] %v257_v35  ;;  %v69_v62 = vsel %vm2097_vm2, 0, %v68_v54  ;;  %v156_v0 = vor.u32 %v154_v50, %v153_v57  ;;  %v77_v35 = vld [vmem:[#allocation2 + $0x3c] sm:$0x1] }
  0x5b   :  { %246 = vst [vmem:[#allocation2 + $0x24] sm:$0xf] %v245_v60 }
  0x5c   :  { %v666_v63 = vor.u32 %v664_v45, %v663_v38  ;;  %70 = vst [vmem:[#allocation2 + $0x30] sm:$0x1] %v69_v62  ;;  %v92_v45 = vld [vmem:[#allocation3 + $0x68] sm:$0x7f] }
  0x5d   :  { %v106_v50 = vpack.c.bf16 %v92_v45, %v92_v45 }
  0x5e   :  { %v250_v49 = vld [vmem:[#allocation2 + $0x2c] sm:$0xf] }
  0x5f   :  { %v193_v58 = vshrl.u32 %v106_v50, 16  ;;  %v196_v60 = vshll.u32 %v106_v50, 16 }
  0x60   :  { %901 = vrot.lane.b32.xlu2 %v2054_v15, %s2003_s20  ;;  %899 = vrot.lane.b32.xlu1 %v2056_v16, %s2003_s20  ;;  %v95_v15 = vpack.c.bf16 %v81_v7, %v81_v7  ;;  %v56_v16 = vld [vmem:[#allocation2 + $0x1c] sm:$0x1]  ;;  %v89_v7 = vld [vmem:[#allocation3 + $0x50] sm:$0x7f] }
  0x61   :  { %763 = vrot.lane.b32.xlu0 %v722_v51, %s2002_s19  ;;  %v57_v19 = vsel %vm2097_vm2, 0, %v56_v16  ;;  %v699_v16 = vshll.u32 %v619_v40, 16  ;;  %v78_v40 = vsel %vm2097_vm2, 0, %v77_v35  ;;  %vm931_vm2 = vcmask 322816  }
  0x62   :  { %v319_v8 = vpop.permute.xlu2 %318  ;;  %v116_v24 = vshrl.u32 %v95_v15, 16  ;;  %v119_v26 = vshll.u32 %v95_v15, 16  ;;  %58 = vst [vmem:[#allocation2 + $0x1c] sm:$0x1] %v57_v19  ;;  %v103_v15 = vpack.c.bf16 %v89_v7, %v89_v7  ;;  %v182_v19 = vshll.u32 %v104_v4, 16 }
  0x63   :  { %356 = vst.msk [vmem:[#allocation2 + $0x14] sm:$0xf] %vm265_vm6, %v319_v8  ;;  %v701_v30 = vor.u32 %v699_v16, %v698_v12  ;;  %v253_v37 = vld [vmem:[#allocation2 + $0x30] sm:$0xf] }
  0x64   :  { %v118_v36 = vrot.slane %v116_v24, 7  ;;  %v175_v27 = vshll.u32 %v103_v15, 16  ;;  %79 = vst [vmem:[#allocation2 + $0x3c] sm:$0x1] %v78_v40  ;;  %v599_v12 = vld [vmem:[#allocation3 + $0x30] sm:$0x7f] }
  0x66   :  { %v121_v42 = vor.u32 %v119_v26, %v118_v36  ;;  %v172_v26 = vshrl.u32 %v103_v15, 16  ;;  %v93_v36 = vld [vmem:[#allocation3 + $0x70] sm:$0x7f] }
  0x67   :  { %v107_v43 = vpack.c.bf16 %v93_v36, %v93_v36 }
  0x68   :  { %745 = vrot.lane.b32.xlu2 %v659_v20, %s2002_s19  ;;  %909 = vrot.lane.b32.xlu1 %v2080_v29, %s2003_s20  ;;  %v227_v29 = vsel %vm2108_vm5, %v121_v42, %v226_v48  ;;  %v174_v32 = vrot.slane %v172_v26, 7  ;;  %v595_v26 = vld [vmem:[#allocation3 + $0x10] sm:$0x7f] }
  0x69   :  { %907 = vrot.lane.b32.xlu0 %v2066_v21, %s2003_s20  ;;  %v607_v21 = vld [vmem:[#allocation3 + $0x70] sm:$0x7f]  ;;  %v241_v61 = vld [vmem:[#allocation2 + $0x1c] sm:$0xf]  ;;  %228 = vst [vmem:[#allocation2 + $0x8] sm:$0xf] %v227_v29 }
  0x6a   :  { %v384_v51 = vld [vmem:[#allocation2 + $0x14] sm:$0x8]  ;;  %v321_v52 = vpop.permute.xlu2 %320  ;;  %v242_v8 = vsel %vm2108_vm5, %v156_v0, %v241_v61  ;;  %v623_v13 = vpack.c.bf16 %v607_v21, %v607_v21  ;;  %v177_v38 = vor.u32 %v175_v27, %v174_v32  ;;  %v203_v46 = vshll.u32 %v107_v43, 16 }
  0x6b   :  { %v385_v56 = vsel %vm2159_vm9, 0, %v384_v51  ;;  %357 = vst.msk [vmem:[#allocation2 + $0x18] sm:$0xf] %vm265_vm6, %v321_v52  ;;  %v705_v51 = vrot.slane %v703_v33, 7  ;;  %v706_v52 = vshll.u32 %v620_v14, 16  ;;  %v615_v27 = vpack.c.bf16 %v599_v12, %v599_v12 }
  0x6c   :  { %386 = vst [vmem:[#allocation2 + $0x14] sm:$0x8] %v385_v56  ;;  %v724_v31 = vshrl.u32 %v623_v13, 16  ;;  %v727_v48 = vshll.u32 %v623_v13, 16  ;;  %v251_v55 = vsel %vm2108_vm5, %v177_v38, %v250_v49  ;;  %v200_v56 = vshrl.u32 %v107_v43, 16 }
  0x6d   :  { %243 = vst [vmem:[#allocation2 + $0x1c] sm:$0xf] %v242_v8  ;;  %v708_v59 = vor.u32 %v706_v52, %v705_v51  ;;  %v262_v62 = vld [vmem:[#allocation2 + $0x3c] sm:$0xf]  ;;  %v259_v8 = vld [vmem:[#allocation2 + $0x38] sm:$0xf]  ;;  %v1022_v13 = vpack.c.bf16 %v1006_v1, %v1006_v1 }
  0x6e   :  { %v726_v47 = vrot.slane %v724_v31, 7  ;;  %252 = vst [vmem:[#allocation2 + $0x2c] sm:$0xf] %v251_v55  ;;  %v202_v57 = vrot.slane %v200_v56, 7  ;;  %v596_v14 = vld [vmem:[#allocation3 + $0x18] sm:$0x7f] }
  0x6f   :  { %v668_v40 = vshrl.u32 %v615_v27, 16  ;;  %v671_v49 = vshll.u32 %v615_v27, 16 }
  0x70   :  { %885 = vrot.lane.b32.xlu2 %v2046_v11, %s2003_s20  ;;  %883 = vrot.lane.b32.xlu1 %v2035_v5, %s2003_s20  ;;  %v181_v5 = vrot.slane %v179_v18, 7  ;;  %v205_v61 = vor.u32 %v203_v46, %v202_v57 }
  0x71   :  { %747 = vrot.lane.b32.xlu0 %v666_v63, %s2002_s19  ;;  %v195_v63 = vrot.slane %v193_v58, 7 }
  0x72   :  { %v387_v20 = vld [vmem:[#allocation2 + $0x18] sm:$0x8]  ;;  %v327_v24 = vpop.permute.xlu2 %326  ;;  %v184_v34 = vor.u32 %v182_v19, %v181_v5  ;;  %v263_v0 = vsel %vm2108_vm5, %v205_v61, %v262_v62  ;;  %v1010_v5 = vld [vmem:[#allocation3 + $0x61] sm:$0x7f] }
  0x73   :  { %v388_v11 = vsel %vm2159_vm9, 0, %v387_v20  ;;  %360 = vst.msk [vmem:[#allocation2 + $0x28] sm:$0xf] %vm265_vm6, %v327_v24  ;;  %v198_v2 = vor.u32 %v196_v60, %v195_v63  ;;  %v1026_v38 = vpack.c.bf16 %v1010_v5, %v1010_v5 }
  0x74   :  { %389 = vst [vmem:[#allocation2 + $0x18] sm:$0x8] %v388_v11  ;;  %v254_v42 = vsel %vm2108_vm5, %v184_v34, %v253_v37  ;;  %v612_v11 = vpack.c.bf16 %v596_v14, %v596_v14  ;;  %v1007_v34 = vld [vmem:[#allocation3 + $0x49] sm:$0x7f]  ;;  %v1027_v37 = vpack.c.bf16 %v1011_v25, %v1011_v25 }
  0x75   :  { %255 = vst [vmem:[#allocation2 + $0x30] sm:$0xf] %v254_v42  ;;  %v260_v20 = vsel %vm2108_vm5, %v198_v2, %v259_v8  ;;  %v1023_v43 = vpack.c.bf16 %v1007_v34, %v1007_v34 }
  0x76   :  { %264 = vst [vmem:[#allocation2 + $0x3c] sm:$0xf] %v263_v0  ;;  %v647_v41 = vshrl.u32 %v612_v11, 16  ;;  %v650_v51 = vshll.u32 %v612_v11, 16 }
  0x77   :  { %261 = vst [vmem:[#allocation2 + $0x38] sm:$0xf] %v260_v20  ;;  %v998_v20 = vld [vmem:[#allocation3 + $0x1] sm:$0x7f] }
  0x78   :  { %757 = vrot.lane.b32.xlu2 %v701_v30, %s2002_s19  ;;  %893 = vrot.lane.b32.xlu1 %v2042_v9, %s2003_s20  ;;  %v611_v30 = vpack.c.bf16 %v595_v26, %v595_v26  ;;  %v649_v50 = vrot.slane %v647_v41, 7 }
  0x79   :  { %891 = vrot.lane.b32.xlu0 %v2033_v3, %s2003_s20  ;;  %v729_v3 = vor.u32 %v727_v48, %v726_v47  ;;  %v670_v48 = vrot.slane %v668_v40, 7 }
  0x7a   :  { %v396_v29 = vld [vmem:[#allocation2 + $0x28] sm:$0x8]  ;;  %v333_v53 = vpop.permute.xlu2 %332  ;;  %v315_v54 = vpop.permute.xlu1 %314  ;;  %v640_v44 = vshrl.u32 %v611_v30, 16  ;;  %v643_v55 = vshll.u32 %v611_v30, 16  ;;  %v652_v58 = vor.u32 %v650_v51, %v649_v50 }
  0x7b   :  { %v397_v9 = vsel %vm2159_vm9, 0, %v396_v29  ;;  %363 = vst.msk [vmem:[#allocation2 + $0x34] sm:$0xf] %vm265_vm6, %v333_v53  ;;  %v311_v21 = vpop.permute.xlu0 %310  ;;  %v673_v57 = vor.u32 %v671_v49, %v670_v48  ;;  %v1008_v48 = vld [vmem:[#allocation3 + $0x51] sm:$0x7f] }
  0x7c   :  { %398 = vst [vmem:[#allocation2 + $0x28] sm:$0x8] %v397_v9  ;;  %v642_v52 = vrot.slane %v640_v44, 7 }
  0x7d   :  { %354 = vst.msk [vmem:[#allocation2 + $0xc] sm:$0xf] %vm265_vm6, %v315_v54 }
  0x7e   :  { %352 = vst.msk [vmem:[#allocation2 + $0x4] sm:$0xf] %vm265_vm6, %v311_v21  ;;  %v645_v61 = vor.u32 %v643_v55, %v642_v52  ;;  %v1003_v52 = vld [vmem:[#allocation3 + $0x29] sm:$0x7f] }
  0x80   :  { %903 = vrot.lane.b32.xlu2 %v2070_v23, %s2003_s20  ;;  %765 = vrot.lane.b32.xlu1 %v729_v3, %s2002_s19 }
  0x81   :  { %759 = vrot.lane.b32.xlu0 %v708_v59, %s2002_s19 }
  0x82   :  { %v405_v4 = vld [vmem:[#allocation2 + $0x34] sm:$0x8]  ;;  %v457_v6 = vpop.permute.xlu2 %456  ;;  %v317_v7 = vpop.permute.xlu1 %316 }
  0x83   :  { %v406_v15 = vsel %vm2159_vm9, 0, %v405_v4  ;;  %355 = vst.msk [vmem:[#allocation2 + $0x10] sm:$0xf] %vm265_vm6, %v317_v7  ;;  %v313_v23 = vpop.permute.xlu0 %312  ;;  %v837_v4 = vld [vmem:[#allocation3 + $0x10] sm:$0xff] }
  0x84   :  { %407 = vst [vmem:[#allocation2 + $0x34] sm:$0x8] %v406_v15  ;;  %v378_v16 = vld [vmem:[#allocation2 + $0xc] sm:$0x8]  ;;  %v2272_v12 = vpack.c.bf16 %v837_v4, %v837_v4 }
  0x85   :  { %v379_v18 = vsel %vm2159_vm9, 0, %v378_v16  ;;  %v372_v19 = vld [vmem:[#allocation2 + $0x4] sm:$0x8]  ;;  %353 = vst.msk [vmem:[#allocation2 + $0x8] sm:$0xf] %vm265_vm6, %v313_v23 }
  0x86   :  { %380 = vst [vmem:[#allocation2 + $0xc] sm:$0x8] %v379_v18  ;;  %v373_v24 = vsel %vm2159_vm9, 0, %v372_v19  ;;  %v1002_v18 = vld [vmem:[#allocation3 + $0x21] sm:$0x7f] }
  0x87   :  { %374 = vst [vmem:[#allocation2 + $0x4] sm:$0x8] %v373_v24  ;;  %v999_v19 = vld [vmem:[#allocation3 + $0x9] sm:$0x7f]  ;;  %v2005_v24 = vmov 0   ;;  %v1018_v34 = vpack.c.bf16 %v1002_v18, %v1002_v18 }
  0x88   :  { %1062 = vrot.lane.b32.xlu2 %v1022_v13, %s2004_s21  ;;  %911 = vrot.lane.b32.xlu1 %v2078_v28, %s2003_s20  ;;  %32 = vst.msk [vmem:[#allocation2] sm:$0xf] %vm31_vm3, %v2005_v24 }
  0x89   :  { %905 = vrot.lane.b32.xlu0 %v2068_v22, %s2003_s20  ;;  %266 = vst.msk [vmem:[#allocation2] sm:$0xf] %vm265_vm6, %v2005_v24 }
  0x8a   :  { %v381_v31 = vld [vmem:[#allocation2 + $0x10] sm:$0x8]  ;;  %v463_v32 = vpop.permute.xlu2 %462  ;;  %v325_v33 = vpop.permute.xlu1 %324  ;;  %367 = vst.msk [vmem:[#allocation2] sm:$0xf] %vm366_vm10, %v2005_v24 }
  0x8b   :  { %v382_v35 = vsel %vm2159_vm9, 0, %v381_v31  ;;  %359 = vst.msk [vmem:[#allocation2 + $0x24] sm:$0xf] %vm265_vm6, %v325_v33  ;;  %v323_v28 = vpop.permute.xlu0 %322  ;;  %v1201_v31 = vld [vmem:[#allocation3 + $0x50] sm:$0x7f] }
  0x8c   :  { %383 = vst [vmem:[#allocation2 + $0x10] sm:$0x8] %v382_v35  ;;  %v375_v22 = vld [vmem:[#allocation2 + $0x8] sm:$0x8]  ;;  %v1015_v35 = vpack.c.bf16 %v999_v19, %v999_v19 }
  0x8d   :  { %v376_v42 = vsel %vm2159_vm9, 0, %v375_v22  ;;  %358 = vst.msk [vmem:[#allocation2 + $0x1c] sm:$0xf] %vm265_vm6, %v323_v28  ;;  %v507_v25 = vld [vmem:[#allocation2 + $0xc] sm:$0xf] }
  0x8e   :  { %v501_v45 = vld [vmem:[#allocation2 + $0x4] sm:$0xf]  ;;  %377 = vst [vmem:[#allocation2 + $0x8] sm:$0x8] %v376_v42  ;;  %v1200_v28 = vld [vmem:[#allocation3 + $0x48] sm:$0x7f]  ;;  %v2298_v42 = vpack.c.bf16 %v1201_v31, %v1201_v31 }
  0x8f   :  { %v502_v47 = vsel %vm2236_vm12, %v457_v6, %v501_v45  ;;  %v516_v45 = vld [vmem:[#allocation2 + $0x18] sm:$0xf]  ;;  %33 = vst.msk [vmem:[#allocation2 + $0x20] sm:$0xf] %vm31_vm3, %v2005_v24  ;;  %vm948_vm3 = vcmask 388419  }
  0x90   :  { %503 = vst [vmem:[#allocation2 + $0x4] sm:$0xf] %v502_v47  ;;  %1072 = vrot.lane.b32.xlu2 %v1027_v37, %s2004_s21  ;;  %1070 = vrot.lane.b32.xlu1 %v1026_v38, %s2004_s21  ;;  %v1014_v37 = vpack.c.bf16 %v998_v20, %v998_v20  ;;  %v1009_v47 = vld [vmem:[#allocation3 + $0x59] sm:$0x7f]  ;;  %v1281_v4 = vshll.u32 %v2298_v42, 16  ;;  %vm2402_vm5 = vmand %vm948_vm3, %vm370_vm7 }
  0x91   :  { %1064 = vrot.lane.b32.xlu0 %v1023_v43, %s2004_s21  ;;  %v2300_v43 = vpack.c.bf16 %v1200_v28, %v1200_v28  ;;  %v545_v18 = vld [vmem:[#allocation2] sm:$0x1]  ;;  %267 = vst.msk [vmem:[#allocation2 + $0x20] sm:$0xf] %vm265_vm6, %v2005_v24 }
  0x92   :  { %v393_v29 = vld [vmem:[#allocation2 + $0x24] sm:$0x8]  ;;  %v469_v53 = vpop.permute.xlu2 %468  ;;  %v331_v54 = vpop.permute.xlu1 %330  ;;  %368 = vst.msk [vmem:[#allocation2 + $0x20] sm:$0xf] %vm366_vm10, %v2005_v24 }
  0x93   :  { %v510_v56 = vld [vmem:[#allocation2 + $0x10] sm:$0xf]  ;;  %v394_v9 = vsel %vm2159_vm9, 0, %v393_v29  ;;  %362 = vst.msk [vmem:[#allocation2 + $0x30] sm:$0xf] %vm265_vm6, %v331_v54  ;;  %v329_v21 = vpop.permute.xlu0 %328 }
  0x94   :  { %v511_v46 = vsel %vm2236_vm12, %v463_v32, %v510_v56  ;;  %395 = vst [vmem:[#allocation2 + $0x24] sm:$0x8] %v394_v9  ;;  %v390_v3 = vld [vmem:[#allocation2 + $0x1c] sm:$0x8]  ;;  %v513_v54 = vld [vmem:[#allocation2 + $0x14] sm:$0xf] }
  0x95   :  { %512 = vst [vmem:[#allocation2 + $0x10] sm:$0xf] %v511_v46  ;;  %v391_v60 = vsel %vm2159_vm9, 0, %v390_v3  ;;  %v504_v5 = vld [vmem:[#allocation2 + $0x8] sm:$0xf]  ;;  %v1278_v56 = vshrl.u32 %v2298_v42, 16  ;;  %v1025_v46 = vpack.c.bf16 %v1009_v47, %v1009_v47  ;;  %v1024_v3 = vpack.c.bf16 %v1008_v48, %v1008_v48 }
  0x96   :  { %392 = vst [vmem:[#allocation2 + $0x1c] sm:$0x8] %v391_v60  ;;  %v1271_v9 = vshrl.u32 %v2300_v43, 16  ;;  %v1415_v42 = vld [vmem:[#allocation3 + $0x48] sm:$0xff]  ;;  %v534_v48 = vld [vmem:[#allocation2 + $0x34] sm:$0xf] }
  0x97   :  { %v548_v62 = vld [vmem:[#allocation2 + $0x4] sm:$0x1]  ;;  %361 = vst.msk [vmem:[#allocation2 + $0x2c] sm:$0xf] %vm265_vm6, %v329_v21 }
  0x98   :  { %v549_v63 = vsel %vm2254_vm14, 0, %v548_v62  ;;  %749 = vrot.lane.b32.xlu2 %v673_v57, %s2002_s19  ;;  %743 = vrot.lane.b32.xlu1 %v652_v58, %s2002_s19  ;;  %v1205_v57 = vld [vmem:[#allocation3 + $0x70] sm:$0x7f] }
  0x99   :  { %550 = vst [vmem:[#allocation2 + $0x4] sm:$0x1] %v549_v63  ;;  %741 = vrot.lane.b32.xlu0 %v645_v61, %s2002_s19  ;;  %v1019_v61 = vpack.c.bf16 %v1003_v52, %v1003_v52 }
  0x9a   :  { %v402_v0 = vld [vmem:[#allocation2 + $0x30] sm:$0x8]  ;;  %v475_v1 = vpop.permute.xlu2 %474  ;;  %v337_v2 = vpop.permute.xlu1 %336 }
  0x9b   :  { %v403_v6 = vsel %vm2159_vm9, 0, %v402_v0  ;;  %365 = vst.msk [vmem:[#allocation2 + $0x3c] sm:$0xf] %vm265_vm6, %v337_v2  ;;  %v335_v7 = vpop.permute.xlu0 %334 }
  0x9c   :  { %v557_v8 = vld [vmem:[#allocation2 + $0x10] sm:$0x1]  ;;  %404 = vst [vmem:[#allocation2 + $0x30] sm:$0x8] %v403_v6  ;;  %v1274_v6 = vshll.u32 %v2300_v43, 16 }
  0x9d   :  { %v558_v15 = vsel %vm2254_vm14, 0, %v557_v8  ;;  %v519_v23 = vld [vmem:[#allocation2 + $0x1c] sm:$0xf]  ;;  %364 = vst.msk [vmem:[#allocation2 + $0x38] sm:$0xf] %vm265_vm6, %v335_v7  ;;  %vm1094_vm6 = vcmask 388416  }
  0x9e   :  { %559 = vst [vmem:[#allocation2 + $0x10] sm:$0x1] %v558_v15  ;;  %v520_v16 = vsel %vm2236_vm12, %v469_v53, %v519_v23  ;;  %v399_v13 = vld [vmem:[#allocation2 + $0x2c] sm:$0x8]  ;;  %v525_v8 = vld [vmem:[#allocation2 + $0x28] sm:$0xf]  ;;  %vm2428_vm8 = vmand %vm1094_vm6, %vm499_vm11 }
  0x9f   :  { %521 = vst [vmem:[#allocation2 + $0x1c] sm:$0xf] %v520_v16  ;;  %v400_v14 = vsel %vm2159_vm9, 0, %v399_v13  ;;  %v1280_v15 = vrot.slane %v1278_v56, 7  ;;  %v1273_v23 = vrot.slane %v1271_v9, 7  ;;  %v1219_v16 = vpack.c.bf16 %v1205_v57, %v1205_v57  ;;  %v1420_v57 = vld [vmem:[#allocation3 + $0x70] sm:$0xff] }
  0xa0   :  { %401 = vst [vmem:[#allocation2 + $0x2c] sm:$0x8] %v400_v14  ;;  %895 = vrot.lane.b32.xlu2 %v2058_v17, %s2003_s20  ;;  %889 = vrot.lane.b32.xlu1 %v2044_v10, %s2003_s20  ;;  %v790_v50 = vld [vmem:[#allocation2 + $0x4] sm:$0xf] }
  0xa1   :  { %887 = vrot.lane.b32.xlu0 %v2272_v12, %s2003_s20  ;;  %v1276_v31 = vor.u32 %v1274_v6, %v1273_v23  ;;  %v1434_v23 = vpack.c.bf16 %v1420_v57, %v1420_v57 }
  0xa2   :  { %v411_v26 = vld [vmem:[#allocation2 + $0x3c] sm:$0x8]  ;;  %v481_v27 = vpop.permute.xlu2 %480  ;;  %v461_v11 = vpop.permute.xlu1 %460 }
  0xa3   :  { %v412_v17 = vsel %vm2159_vm9, 0, %v411_v26  ;;  %v508_v10 = vsel %vm2236_vm12, %v461_v11, %v507_v25  ;;  %v459_v30 = vpop.permute.xlu0 %458  ;;  %v1012_v26 = vld [vmem:[#allocation3 + $0x71] sm:$0x7f] }
  0xa4   :  { %413 = vst [vmem:[#allocation2 + $0x3c] sm:$0x8] %v412_v17  ;;  %v408_v32 = vld [vmem:[#allocation2 + $0x38] sm:$0x8]  ;;  %v505_v33 = vsel %vm2236_vm12, %v459_v30, %v504_v5  ;;  %v522_v5 = vld [vmem:[#allocation2 + $0x24] sm:$0xf]  ;;  %v1283_v30 = vor.u32 %v1281_v4, %v1280_v15 }
  0xa5   :  { %v409_v22 = vsel %vm2159_vm9, 0, %v408_v32  ;;  %509 = vst [vmem:[#allocation2 + $0xc] sm:$0xf] %v508_v10  ;;  %v1306_v32 = vshrl.u32 %v1219_v16, 16  ;;  %v531_v52 = vld [vmem:[#allocation2 + $0x30] sm:$0xf] }
  0xa6   :  { %v566_v38 = vld [vmem:[#allocation2 + $0x1c] sm:$0x1]  ;;  %410 = vst [vmem:[#allocation2 + $0x38] sm:$0x8] %v409_v22  ;;  %vm1148_vm9 = vcmask 450944  }
  0xa7   :  { %v567_v40 = vsel %vm2254_vm14, 0, %v566_v38  ;;  %v528_v41 = vld [vmem:[#allocation2 + $0x2c] sm:$0xf]  ;;  %506 = vst [vmem:[#allocation2 + $0x8] sm:$0xf] %v505_v33  ;;  %v1308_v38 = vrot.slane %v1306_v32, 7  ;;  %vm2447_vm10 = vmand %vm1148_vm9, %vm36_vm1 }
  0xa8   :  { %568 = vst [vmem:[#allocation2 + $0x1c] sm:$0x1] %v567_v40  ;;  %v529_v44 = vsel %vm2236_vm12, %v475_v1, %v528_v41  ;;  %1054 = vrot.lane.b32.xlu2 %v1018_v34, %s2004_s21  ;;  %1048 = vrot.lane.b32.xlu1 %v1015_v35, %s2004_s21  ;;  %v1204_v1 = vld [vmem:[#allocation3 + $0x68] sm:$0x7f]  ;;  %v1028_v34 = vpack.c.bf16 %v1012_v26, %v1012_v26  ;;  %v1309_v40 = vshll.u32 %v1219_v16, 16  ;;  %vm1145_vm1 = vcmask 454016  }
  0xa9   :  { %530 = vst [vmem:[#allocation2 + $0x2c] sm:$0xf] %v529_v44  ;;  %1046 = vrot.lane.b32.xlu0 %v1014_v37, %s2004_s21  ;;  %v1218_v14 = vpack.c.bf16 %v1204_v1, %v1204_v1  ;;  %v1193_v26 = vld [vmem:[#allocation3 + $0x8] sm:$0x7f] }
  0xaa   :  { %v740_v49 = vpop.permute.xlu2 %739  ;;  %v467_v51 = vpop.permute.xlu1 %466  ;;  %v1311_v56 = vor.u32 %v1309_v40, %v1308_v38 }
  0xab   :  { %v791_v55 = vsel %vm2307_vm0, %v740_v49, %v790_v50  ;;  %v517_v29 = vsel %vm2236_vm12, %v467_v51, %v516_v45  ;;  %v465_v53 = vpop.permute.xlu0 %464  ;;  %v1299_v35 = vshrl.u32 %v1218_v14, 16  ;;  %v1302_v44 = vshll.u32 %v1218_v14, 16 }
  0xac   :  { %v554_v21 = vld [vmem:[#allocation2 + $0xc] sm:$0x1]  ;;  %792 = vst [vmem:[#allocation2 + $0x4] sm:$0xf] %v791_v55  ;;  %v514_v0 = vsel %vm2236_vm12, %v465_v53, %v513_v54  ;;  %v1429_v54 = vpack.c.bf16 %v1415_v42, %v1415_v42 }
  0xad   :  { %v537_v58 = vld [vmem:[#allocation2 + $0x38] sm:$0xf]  ;;  %v555_v60 = vsel %vm2254_vm14, 0, %v554_v21  ;;  %518 = vst [vmem:[#allocation2 + $0x18] sm:$0xf] %v517_v29  ;;  %v1301_v43 = vrot.slane %v1299_v35, 7 }
  0xae   :  { %v538_v62 = vsel %vm2236_vm12, %v481_v27, %v537_v58  ;;  %556 = vst [vmem:[#allocation2 + $0xc] sm:$0x1] %v555_v60  ;;  %v551_v63 = vld [vmem:[#allocation2 + $0x8] sm:$0x1]  ;;  %v546_v27 = vsel %vm2254_vm14, 0, %v545_v18 }
  0xaf   :  { %539 = vst [vmem:[#allocation2 + $0x38] sm:$0xf] %v538_v62  ;;  %v552_v2 = vsel %vm2254_vm14, 0, %v551_v63  ;;  %v1304_v21 = vor.u32 %v1302_v44, %v1301_v43  ;;  %v1419_v58 = vld [vmem:[#allocation3 + $0x68] sm:$0xff]  ;;  %v799_v62 = vld [vmem:[#allocation2 + $0x10] sm:$0xf] }
  0xb0   :  { %v578_v7 = vld [vmem:[#allocation2 + $0x2c] sm:$0x1]  ;;  %553 = vst [vmem:[#allocation2 + $0x8] sm:$0x1] %v552_v2  ;;  %1068 = vrot.lane.b32.xlu2 %v1025_v46, %s2004_s21  ;;  %1066 = vrot.lane.b32.xlu1 %v1024_v3, %s2004_s21  ;;  %v569_v3 = vld [vmem:[#allocation2 + $0x20] sm:$0x1]  ;;  %v1433_v16 = vpack.c.bf16 %v1419_v58, %v1419_v58 }
  0xb1   :  { %v579_v13 = vsel %vm2254_vm14, 0, %v578_v7  ;;  %515 = vst [vmem:[#allocation2 + $0x14] sm:$0xf] %v514_v0  ;;  %1056 = vrot.lane.b32.xlu0 %v1019_v61, %s2004_s21  ;;  %v570_v60 = vsel %vm2254_vm14, 0, %v569_v3  ;;  %v1416_v0 = vld [vmem:[#allocation3 + $0x50] sm:$0xff] }
  0xb2   :  { %580 = vst [vmem:[#allocation2 + $0x2c] sm:$0x1] %v579_v13  ;;  %v2337_v19 = vpop.permute.xlu2 %761  ;;  %v473_v20 = vpop.permute.xlu1 %472  ;;  %v540_v7 = vld [vmem:[#allocation2 + $0x3c] sm:$0xf]  ;;  %v1197_v13 = vld [vmem:[#allocation3 + $0x28] sm:$0x7f]  ;;  %v1430_v14 = vpack.c.bf16 %v1416_v0, %v1416_v0 }
  0xb3   :  { %v526_v11 = vsel %vm2236_vm12, %v473_v20, %v525_v8  ;;  %v471_v25 = vpop.permute.xlu0 %470  ;;  %547 = vst [vmem:[#allocation2] sm:$0x1] %v546_v27  ;;  %v1194_v18 = vld [vmem:[#allocation3 + $0x10] sm:$0x7f] }
  0xb4   :  { %v563_v17 = vld [vmem:[#allocation2 + $0x18] sm:$0x1]  ;;  %527 = vst [vmem:[#allocation2 + $0x28] sm:$0xf] %v526_v11  ;;  %v523_v10 = vsel %vm2236_vm12, %v471_v25, %v522_v5  ;;  %v1211_v11 = vpack.c.bf16 %v1197_v13, %v1197_v13  ;;  %v1208_v36 = vpack.c.bf16 %v1194_v18, %v1194_v18  ;;  %v1004_v5 = vld [vmem:[#allocation3 + $0x31] sm:$0x7f] }
  0xb5   :  { %v564_v33 = vsel %vm2254_vm14, 0, %v563_v17  ;;  %524 = vst [vmem:[#allocation2 + $0x24] sm:$0xf] %v523_v10  ;;  %v1001_v17 = vld [vmem:[#allocation3 + $0x19] sm:$0x7f]  ;;  %v1207_v10 = vpack.c.bf16 %v1193_v26, %v1193_v26 }
  0xb6   :  { %v587_v28 = vld [vmem:[#allocation2 + $0x38] sm:$0x1]  ;;  %565 = vst [vmem:[#allocation2 + $0x18] sm:$0x1] %v564_v33  ;;  %v1000_v33 = vld [vmem:[#allocation3 + $0x11] sm:$0x7f]  ;;  %v1017_v38 = vpack.c.bf16 %v1001_v17, %v1001_v17 }
  0xb7   :  { %v588_v22 = vsel %vm2254_vm14, 0, %v587_v28  ;;  %571 = vst [vmem:[#allocation2 + $0x20] sm:$0x1] %v570_v60  ;;  %v1250_v28 = vshrl.u32 %v1211_v11, 16  ;;  %v1229_v40 = vshrl.u32 %v1208_v36, 16  ;;  %v1222_v42 = vshrl.u32 %v1207_v10, 16 }
  0xb8   :  { %589 = vst [vmem:[#allocation2 + $0x38] sm:$0x1] %v588_v22  ;;  %v560_v37 = vld [vmem:[#allocation2 + $0x14] sm:$0x1]  ;;  %1335 = vrot.lane.b32.xlu2 %v1283_v30, %s2006_s22  ;;  %1333 = vrot.lane.b32.xlu1 %v1276_v31, %s2006_s22  ;;  %v1225_v59 = vshll.u32 %v1207_v10, 16 }
  0xb9   :  { %v561_v41 = vsel %vm2254_vm14, 0, %v560_v37  ;;  %1074 = vrot.lane.b32.xlu0 %v1028_v34, %s2004_s21  ;;  %v1020_v37 = vpack.c.bf16 %v1004_v5, %v1004_v5  ;;  %v1198_v44 = vld [vmem:[#allocation3 + $0x30] sm:$0x7f] }
  0xba   :  { %562 = vst [vmem:[#allocation2 + $0x14] sm:$0x1] %v561_v41  ;;  %v2358_v45 = vpop.permute.xlu2 %901  ;;  %v479_v47 = vpop.permute.xlu1 %478  ;;  %v787_v46 = vld [vmem:[#allocation2] sm:$0xf]  ;;  %v1016_v41 = vpack.c.bf16 %v1000_v33, %v1000_v33  ;;  %v1413_v5 = vld [vmem:[#allocation3 + $0x30] sm:$0xff] }
  0xbb   :  { %v575_v49 = vld [vmem:[#allocation2 + $0x28] sm:$0x1]  ;;  %v535_v50 = vsel %vm2236_vm12, %v479_v47, %v534_v48  ;;  %v477_v51 = vpop.permute.xlu0 %476 }
  0xbc   :  { %v576_v55 = vsel %vm2254_vm14, 0, %v575_v49  ;;  %v572_v29 = vld [vmem:[#allocation2 + $0x24] sm:$0x1]  ;;  %536 = vst [vmem:[#allocation2 + $0x34] sm:$0xf] %v535_v50  ;;  %v532_v53 = vsel %vm2236_vm12, %v477_v51, %v531_v52  ;;  %v1252_v49 = vrot.slane %v1250_v28, 7 }
  0xbd   :  { %577 = vst [vmem:[#allocation2 + $0x28] sm:$0x1] %v576_v55  ;;  %v573_v9 = vsel %vm2254_vm14, 0, %v572_v29  ;;  %v1231_v51 = vrot.slane %v1229_v40, 7  ;;  %v1232_v52 = vshll.u32 %v1208_v36, 16  ;;  %v1224_v55 = vrot.slane %v1222_v42, 7 }
  0xbe   :  { %574 = vst [vmem:[#allocation2 + $0x24] sm:$0x1] %v573_v9  ;;  %v811_v25 = vld [vmem:[#allocation2 + $0x20] sm:$0xf]  ;;  %v1212_v29 = vpack.c.bf16 %v1198_v44, %v1198_v44 }
  0xbf   :  { %533 = vst [vmem:[#allocation2 + $0x30] sm:$0xf] %v532_v53 }
  0xc0   :  { %1464 = vrot.lane.b32.xlu2 %v1429_v54, %s2007_s23  ;;  %1343 = vrot.lane.b32.xlu1 %v1311_v56, %s2006_s22  ;;  %v1257_v0 = vshrl.u32 %v1212_v29, 16 }
  0xc1   :  { %1341 = vrot.lane.b32.xlu0 %v1304_v21, %s2006_s22 }
  0xc2   :  { %v746_v61 = vpop.permute.xlu2 %745  ;;  %v738_v63 = vpop.permute.xlu1 %737 }
  0xc3   :  { %v584_v1 = vld [vmem:[#allocation2 + $0x34] sm:$0x1]  ;;  %v800_v2 = vsel %vm2307_vm0, %v746_v61, %v799_v62  ;;  %v788_v4 = vsel %vm2307_vm0, %v738_v63, %v787_v46  ;;  %v483_v6 = vpop.permute.xlu0 %482  ;;  %v1234_v61 = vor.u32 %v1232_v52, %v1231_v51  ;;  %v1227_v63 = vor.u32 %v1225_v59, %v1224_v55 }
  0xc4   :  { %v585_v8 = vsel %vm2254_vm14, 0, %v584_v1  ;;  %801 = vst [vmem:[#allocation2 + $0x10] sm:$0xf] %v800_v2  ;;  %v541_v15 = vsel %vm2236_vm12, %v483_v6, %v540_v7  ;;  %v817_v56 = vld [vmem:[#allocation2 + $0x28] sm:$0xf]  ;;  %v1259_v7 = vrot.slane %v1257_v0, 7  ;;  %vm2519_vm12 = vmand %vm1145_vm1, %vm221_vm4 }
  0xc5   :  { %586 = vst [vmem:[#allocation2 + $0x34] sm:$0x1] %v585_v8  ;;  %v814_v32 = vld [vmem:[#allocation2 + $0x24] sm:$0xf]  ;;  %v608_v1 = vld [vmem:[#allocation3 + $0x78] sm:$0x7f] }
  0xc6   :  { %v581_v20 = vld [vmem:[#allocation2 + $0x30] sm:$0x1]  ;;  %789 = vst [vmem:[#allocation2] sm:$0xf] %v788_v4  ;;  %v624_v4 = vpack.c.bf16 %v608_v1, %v608_v1  ;;  %v1408_v6 = vld [vmem:[#allocation3 + $0x8] sm:$0xff]  ;;  %v1260_v8 = vshll.u32 %v1212_v29, 16 }
  0xc7   :  { %v582_v27 = vsel %vm2254_vm14, 0, %v581_v20  ;;  %542 = vst [vmem:[#allocation2 + $0x3c] sm:$0xf] %v541_v15  ;;  %v1422_v18 = vpack.c.bf16 %v1408_v6, %v1408_v6  ;;  %v1418_v6 = vld [vmem:[#allocation3 + $0x60] sm:$0xff]  ;;  %vm1405_vm4 = vcmask 519616  }
  0xc8   :  { %583 = vst [vmem:[#allocation2 + $0x30] sm:$0x1] %v582_v27  ;;  %1474 = vrot.lane.b32.xlu2 %v1434_v23, %s2007_s23  ;;  %1472 = vrot.lane.b32.xlu1 %v1433_v16, %s2007_s23  ;;  %v731_v20 = vshrl.u32 %v624_v4, 16  ;;  %v1262_v26 = vor.u32 %v1260_v8, %v1259_v7  ;;  %v1203_v27 = vld [vmem:[#allocation3 + $0x60] sm:$0x7f]  ;;  %v1417_v7 = vld [vmem:[#allocation3 + $0x58] sm:$0xff] }
  0xc9   :  { %1466 = vrot.lane.b32.xlu0 %v1430_v14, %s2007_s23  ;;  %v1217_v17 = vpack.c.bf16 %v1203_v27, %v1203_v27 }
  0xca   :  { %v886_v30 = vpop.permute.xlu2 %885  ;;  %v756_v31 = vpop.permute.xlu1 %755  ;;  %v733_v36 = vrot.slane %v731_v20, 7 }
  0xcb   :  { %933 = vst.msk [vmem:[#allocation2 + $0x4] sm:$0xf] %vm931_vm2, %v886_v30  ;;  %v815_v34 = vsel %vm2307_vm0, %v756_v31, %v814_v32  ;;  %v754_v35 = vpop.permute.xlu0 %753  ;;  %v1292_v42 = vshrl.u32 %v1217_v17, 16  ;;  %v1295_v52 = vshll.u32 %v1217_v17, 16 }
  0xcc   :  { %816 = vst [vmem:[#allocation2 + $0x24] sm:$0xf] %v815_v34  ;;  %v812_v22 = vsel %vm2307_vm0, %v754_v35, %v811_v25  ;;  %v826_v57 = vld [vmem:[#allocation2 + $0x34] sm:$0xf]  ;;  %v734_v25 = vshll.u32 %v624_v4, 16  ;;  %v1412_v35 = vld [vmem:[#allocation3 + $0x28] sm:$0xff] }
  0xcd   :  { %941 = vst.msk [vmem:[#allocation2 + $0x24] sm:$0xf] %vm931_vm2, %v2358_v45  ;;  %v1253_v45 = vshll.u32 %v1211_v11, 16  ;;  %v1202_v11 = vld [vmem:[#allocation3 + $0x58] sm:$0x7f]  ;;  %v1294_v51 = vrot.slane %v1292_v42, 7 }
  0xce   :  { %v590_v43 = vld [vmem:[#allocation2 + $0x3c] sm:$0x1]  ;;  %813 = vst [vmem:[#allocation2 + $0x20] sm:$0xf] %v812_v22  ;;  %v1216_v10 = vpack.c.bf16 %v1202_v11, %v1202_v11  ;;  %v802_v34 = vld [vmem:[#allocation2 + $0x14] sm:$0xf] }
  0xcf   :  { %v823_v47 = vld [vmem:[#allocation2 + $0x30] sm:$0xf]  ;;  %v591_v48 = vsel %vm2254_vm14, 0, %v590_v43  ;;  %v1255_v60 = vor.u32 %v1253_v45, %v1252_v49  ;;  %v1426_v49 = vpack.c.bf16 %v1412_v35, %v1412_v35  ;;  %v1206_v45 = vld [vmem:[#allocation3 + $0x78] sm:$0x7f]  ;;  %vm2577_vm14 = vmand %vm1509_vm13, %vm370_vm7  ;;  %vm1506_vm7 = vcmask 585216  }
  0xd0   :  { %v824_v50 = vsel %vm2307_vm0, %v2337_v19, %v823_v47  ;;  %592 = vst [vmem:[#allocation2 + $0x3c] sm:$0x1] %v591_v48  ;;  %1058 = vrot.lane.b32.xlu2 %v1020_v37, %s2004_s21  ;;  %1052 = vrot.lane.b32.xlu1 %v1017_v38, %s2004_s21  ;;  %v1427_v37 = vpack.c.bf16 %v1413_v5, %v1413_v5  ;;  %v1285_v43 = vshrl.u32 %v1216_v10, 16  ;;  %v1288_v59 = vshll.u32 %v1216_v10, 16  ;;  %vm2627_vm3 = vmand %vm1506_vm7, %vm499_vm11 }
  0xd1   :  { %825 = vst [vmem:[#allocation2 + $0x30] sm:$0xf] %v824_v50  ;;  %1050 = vrot.lane.b32.xlu0 %v1016_v41, %s2004_s21  ;;  %v736_v41 = vor.u32 %v734_v25, %v733_v36  ;;  %v1220_v29 = vpack.c.bf16 %v1206_v45, %v1206_v45  ;;  %v1432_v25 = vpack.c.bf16 %v1418_v6, %v1418_v6  ;;  %vm1777_vm11 = vcmask 588800  }
  0xd2   :  { %v953_v19 = vld [vmem:[#allocation2 + $0x4] sm:$0x8]  ;;  %v758_v54 = vpop.permute.xlu2 %757  ;;  %v900_v9 = vpop.permute.xlu1 %899  ;;  %v1287_v55 = vrot.slane %v1285_v43, 7  ;;  %v1431_v5 = vpack.c.bf16 %v1417_v7, %v1417_v7  ;;  %v1196_v43 = vld [vmem:[#allocation3 + $0x20] sm:$0x7f] }
  0xd3   :  { %v954_v21 = vsel %vm2402_vm5, 0, %v953_v19  ;;  %v818_v46 = vsel %vm2307_vm0, %v758_v54, %v817_v56  ;;  %940 = vst.msk [vmem:[#allocation2 + $0x20] sm:$0xf] %vm931_vm2, %v900_v9  ;;  %v764_v3 = vpop.permute.xlu0 %763  ;;  %v1313_v1 = vshrl.u32 %v1220_v29, 16  ;;  %v1705_v19 = vld [vmem:[%s2808_s1 + $0x20] sm:$0xf] }
  0xd4   :  { %955 = vst [vmem:[#allocation2 + $0x4] sm:$0x8] %v954_v21  ;;  %v827_v58 = vsel %vm2307_vm0, %v764_v3, %v826_v57  ;;  %v977_v62 = vld [vmem:[#allocation2 + $0x24] sm:$0x8]  ;;  %v850_v21 = vld [vmem:[#allocation3 + $0x78] sm:$0xff] }
  0xd5   :  { %819 = vst [vmem:[#allocation2 + $0x28] sm:$0xf] %v818_v46  ;;  %v978_v2 = vsel %vm2402_vm5, 0, %v977_v62  ;;  %v866_v0 = vpack.c.bf16 %v850_v21, %v850_v21  ;;  %v1315_v8 = vrot.slane %v1313_v1, 7 }
  0xd6   :  { %828 = vst [vmem:[#allocation2 + $0x34] sm:$0xf] %v827_v58  ;;  %v1297_v58 = vor.u32 %v1295_v52, %v1294_v51 }
  0xd7   :  { %979 = vst [vmem:[#allocation2 + $0x24] sm:$0x8] %v978_v2 }
  0xd8   :  { %1327 = vrot.lane.b32.xlu2 %v1255_v60, %s2006_s22  ;;  %1321 = vrot.lane.b32.xlu1 %v1234_v61, %s2006_s22  ;;  %v1290_v60 = vor.u32 %v1288_v59, %v1287_v55  ;;  %v600_v61 = vld [vmem:[#allocation3 + $0x38] sm:$0x7f]  ;;  %v1561_v59 = vld [vmem:[#allocation3 + $0x51] sm:$0x7f] }
  0xd9   :  { %1319 = vrot.lane.b32.xlu0 %v1227_v63, %s2006_s22  ;;  %v616_v4 = vpack.c.bf16 %v600_v61, %v600_v61  ;;  %v1575_v1 = vpack.c.bf16 %v1561_v59, %v1561_v59 }
  0xda   :  { %v974_v15 = vld [vmem:[#allocation2 + $0x20] sm:$0x8]  ;;  %v904_v23 = vpop.permute.xlu2 %903  ;;  %v910_v16 = vpop.permute.xlu1 %909 }
  0xdb   :  { %v975_v13 = vsel %vm2402_vm5, 0, %v974_v15  ;;  %942 = vst.msk [vmem:[#allocation2 + $0x28] sm:$0xf] %vm931_vm2, %v904_v23  ;;  %v908_v14 = vpop.permute.xlu0 %907  ;;  %v1316_v15 = vshll.u32 %v1220_v29, 16  ;;  %v675_v17 = vshrl.u32 %v616_v4, 16 }
  0xdc   :  { %976 = vst [vmem:[#allocation2 + $0x20] sm:$0x8] %v975_v13  ;;  %v805_v13 = vld [vmem:[#allocation2 + $0x18] sm:$0xf] }
  0xdd   :  { %945 = vst.msk [vmem:[#allocation2 + $0x34] sm:$0xf] %vm931_vm2, %v910_v16 }
  0xde   :  { %944 = vst.msk [vmem:[#allocation2 + $0x30] sm:$0xf] %vm931_vm2, %v908_v14 }
  0xe0   :  { %1452 = vrot.lane.b32.xlu2 %v2272_v12, %s2007_s23  ;;  %1450 = vrot.lane.b32.xlu1 %v1422_v18, %s2007_s23 }
  0xe1   :  { %1329 = vrot.lane.b32.xlu0 %v1262_v26, %s2006_s22  ;;  %v829_v26 = vld [vmem:[#allocation2 + $0x38] sm:$0xf] }
  0xe2   :  { %v980_v31 = vld [vmem:[#allocation2 + $0x28] sm:$0x8]  ;;  %v1063_v32 = vpop.permute.xlu2 %1062  ;;  %v884_v33 = vpop.permute.xlu1 %883 }
  0xe3   :  { %v981_v12 = vsel %vm2402_vm5, 0, %v980_v31  ;;  %v1120_v28 = vld [vmem:[#allocation2 + $0x20] sm:$0xf]  ;;  %932 = vst.msk [vmem:[#allocation2] sm:$0xf] %vm931_vm2, %v884_v33  ;;  %v748_v22 = vpop.permute.xlu0 %747 }
  0xe4   :  { %982 = vst [vmem:[#allocation2 + $0x28] sm:$0x8] %v981_v12  ;;  %v989_v38 = vld [vmem:[#allocation2 + $0x34] sm:$0x8]  ;;  %v1121_v40 = vsel %vm2428_vm8, %v1063_v32, %v1120_v28  ;;  %v803_v48 = vsel %vm2307_vm0, %v748_v22, %v802_v34  ;;  %v820_v31 = vld [vmem:[#allocation2 + $0x2c] sm:$0xf]  ;;  %v1318_v32 = vor.u32 %v1316_v15, %v1315_v8 }
  0xe5   :  { %v990_v44 = vsel %vm2402_vm5, 0, %v989_v38  ;;  %v986_v47 = vld [vmem:[#allocation2 + $0x30] sm:$0x8]  ;;  %1122 = vst [vmem:[#allocation2 + $0x20] sm:$0xf] %v1121_v40  ;;  %v677_v12 = vrot.slane %v675_v17, 7 }
  0xe6   :  { %991 = vst [vmem:[#allocation2 + $0x34] sm:$0x8] %v990_v44  ;;  %v987_v50 = vsel %vm2402_vm5, 0, %v986_v47  ;;  %v678_v28 = vshll.u32 %v616_v4, 16  ;;  %v1560_v22 = vld [vmem:[#allocation3 + $0x49] sm:$0x7f]  ;;  %v1210_v47 = vpack.c.bf16 %v1196_v43, %v1196_v43 }
  0xe7   :  { %988 = vst [vmem:[#allocation2 + $0x30] sm:$0x8] %v987_v50  ;;  %v1195_v44 = vld [vmem:[#allocation3 + $0x18] sm:$0x7f]  ;;  %v1564_v50 = vld [vmem:[#allocation3 + $0x69] sm:$0x7f] }
  0xe8   :  { %804 = vst [vmem:[#allocation2 + $0x14] sm:$0xf] %v803_v48  ;;  %767 = vrot.lane.b32.xlu2 %v736_v41, %s2002_s19  ;;  %1460 = vrot.lane.b32.xlu1 %v1427_v37, %s2007_s23  ;;  %v1574_v41 = vpack.c.bf16 %v1560_v22, %v1560_v22  ;;  %v680_v42 = vor.u32 %v678_v28, %v677_v12  ;;  %v1565_v48 = vld [vmem:[#allocation3 + $0x71] sm:$0x7f]  ;;  %v1199_v4 = vld [vmem:[#allocation3 + $0x38] sm:$0x7f] }
  0xe9   :  { %1458 = vrot.lane.b32.xlu0 %v1426_v49, %s2007_s23  ;;  %v1209_v49 = vpack.c.bf16 %v1195_v44, %v1195_v44  ;;  %v1579_v21 = vpack.c.bf16 %v1565_v48, %v1565_v48  ;;  %v1246_v7 = vshll.u32 %v1210_v47, 16  ;;  %v1411_v28 = vld [vmem:[#allocation3 + $0x20] sm:$0xff] }
  0xea   :  { %v950_v54 = vld [vmem:[#allocation2] sm:$0x8]  ;;  %v1073_v56 = vpop.permute.xlu2 %1072  ;;  %v894_v9 = vpop.permute.xlu1 %893  ;;  %v1425_v44 = vpack.c.bf16 %v1411_v28, %v1411_v28 }
  0xeb   :  { %v951_v46 = vsel %vm2402_vm5, 0, %v950_v54  ;;  %937 = vst.msk [vmem:[#allocation2 + $0x14] sm:$0xf] %vm931_vm2, %v894_v9  ;;  %v892_v3 = vpop.permute.xlu0 %891  ;;  %v1236_v61 = vshrl.u32 %v1209_v49, 16  ;;  %v1239_v15 = vshll.u32 %v1209_v49, 16 }
  0xec   :  { %v1171_v57 = vld [vmem:[#allocation2 + $0x20] sm:$0x1]  ;;  %952 = vst [vmem:[#allocation2] sm:$0x8] %v951_v46  ;;  %v1243_v46 = vshrl.u32 %v1210_v47, 16 }
  0xed   :  { %v1172_v62 = vsel %vm2447_vm10, 0, %v1171_v57  ;;  %v1135_v63 = vld [vmem:[#allocation2 + $0x34] sm:$0xf]  ;;  %936 = vst.msk [vmem:[#allocation2 + $0x10] sm:$0xf] %vm931_vm2, %v892_v3  ;;  %v1238_v8 = vrot.slane %v1236_v61, 7 }
  0xee   :  { %1173 = vst [vmem:[#allocation2 + $0x20] sm:$0x1] %v1172_v62  ;;  %v1136_v2 = vsel %vm2428_vm8, %v1073_v56, %v1135_v63  ;;  %v1132_v55 = vld [vmem:[#allocation2 + $0x30] sm:$0xf]  ;;  %v1245_v6 = vrot.slane %v1243_v46, 7 }
  0xef   :  { %1137 = vst [vmem:[#allocation2 + $0x34] sm:$0xf] %v1136_v2 }
  0xf0   :  { %1339 = vrot.lane.b32.xlu2 %v1297_v58, %s2006_s22  ;;  %1337 = vrot.lane.b32.xlu1 %v1290_v60, %s2006_s22  ;;  %v1578_v60 = vpack.c.bf16 %v1564_v50, %v1564_v50 }
  0xf1   :  { %913 = vrot.lane.b32.xlu0 %v866_v0, %s2003_s20 }
  0xf2   :  { %v965_v23 = vld [vmem:[#allocation2 + $0x14] sm:$0x8]  ;;  %v750_v16 = vpop.permute.xlu2 %749  ;;  %v766_v14 = vpop.permute.xlu1 %765 }
  0xf3   :  { %v966_v18 = vsel %vm2402_vm5, 0, %v965_v23  ;;  %v806_v20 = vsel %vm2307_vm0, %v750_v16, %v805_v13  ;;  %v760_v27 = vpop.permute.xlu0 %759  ;;  %v830_v36 = vsel %vm2307_vm0, %v766_v14, %v829_v26  ;;  %v1213_v23 = vpack.c.bf16 %v1199_v4, %v1199_v4  ;;  %v796_v14 = vld [vmem:[#allocation2 + $0xc] sm:$0xf] }
  0xf4   :  { %967 = vst [vmem:[#allocation2 + $0x14] sm:$0x8] %v966_v18  ;;  %v962_v11 = vld [vmem:[#allocation2 + $0x10] sm:$0x8]  ;;  %v821_v34 = vsel %vm2307_vm0, %v760_v27, %v820_v31  ;;  %v842_v18 = vld [vmem:[#allocation3 + $0x38] sm:$0xff] }
  0xf5   :  { %v963_v10 = vsel %vm2402_vm5, 0, %v962_v11  ;;  %807 = vst [vmem:[#allocation2 + $0x18] sm:$0xf] %v806_v20  ;;  %v793_v27 = vld [vmem:[#allocation2 + $0x8] sm:$0xf]  ;;  %v858_v17 = vpack.c.bf16 %v842_v18, %v842_v18 }
  0xf6   :  { %v1186_v33 = vld [vmem:[#allocation2 + $0x34] sm:$0x1]  ;;  %964 = vst [vmem:[#allocation2 + $0x10] sm:$0x8] %v963_v10  ;;  %v1264_v10 = vshrl.u32 %v1213_v23, 16 }
  0xf7   :  { %v1187_v35 = vsel %vm2447_vm10, 0, %v1186_v33  ;;  %831 = vst [vmem:[#allocation2 + $0x38] sm:$0xf] %v830_v36  ;;  %v1248_v36 = vor.u32 %v1246_v7, %v1245_v6  ;;  %v1126_v6 = vld [vmem:[#allocation2 + $0x28] sm:$0xf] }
  0xf8   :  { %1188 = vst [vmem:[#allocation2 + $0x34] sm:$0x1] %v1187_v35  ;;  %1470 = vrot.lane.b32.xlu2 %v1432_v25, %s2007_s23  ;;  %1468 = vrot.lane.b32.xlu1 %v1431_v5, %s2007_s23  ;;  %v1241_v25 = vor.u32 %v1239_v15, %v1238_v8  ;;  %v1557_v7 = vld [vmem:[#allocation3 + $0x29] sm:$0x7f] }
  0xf9   :  { %822 = vst [vmem:[#allocation2 + $0x2c] sm:$0xf] %v821_v34  ;;  %1345 = vrot.lane.b32.xlu0 %v1318_v32, %s2006_s22 }
  0xfa   :  { %v896_v37 = vpop.permute.xlu2 %895  ;;  %v912_v38 = vpop.permute.xlu1 %911 }
  0xfb   :  { %938 = vst.msk [vmem:[#allocation2 + $0x18] sm:$0xf] %vm931_vm2, %v896_v37  ;;  %v906_v40 = vpop.permute.xlu0 %905  ;;  %v1410_v37 = vld [vmem:[#allocation3 + $0x18] sm:$0xff] }
  0xfc   :  { %946 = vst.msk [vmem:[#allocation2 + $0x38] sm:$0xf] %vm931_vm2, %v912_v38  ;;  %v1266_v38 = vrot.slane %v1264_v10, 7  ;;  %v1424_v47 = vpack.c.bf16 %v1410_v37, %v1410_v37 }
  0xfd   :  { %943 = vst.msk [vmem:[#allocation2 + $0x2c] sm:$0xf] %vm931_vm2, %v906_v40  ;;  %v1108_v56 = vld [vmem:[#allocation2 + $0x10] sm:$0xf]  ;;  %v1267_v40 = vshll.u32 %v1213_v23, 16 }
  0xfe   :  { %v1111_v23 = vld [vmem:[#allocation2 + $0x14] sm:$0xf] }
  0xff   :  { %v1269_v48 = vor.u32 %v1267_v40, %v1266_v38 }
 0x100   :  { %1609 = vrot.lane.b32.xlu2 %v1574_v41, %s2008_s24  ;;  %751 = vrot.lane.b32.xlu1 %v680_v42, %s2002_s19 }
 0x101   :  { %1476 = vrot.lane.b32.xlu0 %v866_v0, %s2007_s23  ;;  %v1123_v0 = vld [vmem:[#allocation2 + $0x24] sm:$0xf] }
 0x102   :  { %v968_v45 = vld [vmem:[#allocation2 + $0x18] sm:$0x8]  ;;  %v1055_v51 = vpop.permute.xlu2 %1054  ;;  %v1071_v52 = vpop.permute.xlu1 %1070 }
 0x103   :  { %v969_v29 = vsel %vm2402_vm5, 0, %v968_v45  ;;  %v992_v54 = vld [vmem:[#allocation2 + $0x38] sm:$0x8]  ;;  %v1065_v9 = vpop.permute.xlu0 %1064  ;;  %v1109_v58 = vsel %vm2428_vm8, %v1055_v51, %v1108_v56  ;;  %v1133_v63 = vsel %vm2428_vm8, %v1071_v52, %v1132_v55  ;;  %v1554_v52 = vld [vmem:[#allocation3 + $0x11] sm:$0x7f] }
 0x104   :  { %970 = vst [vmem:[#allocation2 + $0x18] sm:$0x8] %v969_v29  ;;  %v993_v3 = vsel %vm2402_vm5, 0, %v992_v54  ;;  %v983_v57 = vld [vmem:[#allocation2 + $0x2c] sm:$0x8]  ;;  %v1124_v2 = vsel %vm2428_vm8, %v1065_v9, %v1123_v0 }
 0x105   :  { %994 = vst [vmem:[#allocation2 + $0x38] sm:$0x8] %v993_v3  ;;  %v984_v62 = vsel %vm2402_vm5, 0, %v983_v57  ;;  %v1553_v55 = vld [vmem:[#allocation3 + $0x9] sm:$0x7f] }
 0x106   :  { %985 = vst [vmem:[#allocation2 + $0x2c] sm:$0x8] %v984_v62  ;;  %v1099_v9 = vld [vmem:[#allocation2 + $0x4] sm:$0xf]  ;;  %v1568_v62 = vpack.c.bf16 %v1554_v52, %v1554_v52  ;;  %v1013_v0 = vld [vmem:[#allocation3 + $0x79] sm:$0x7f] }
 0x107   :  { %1110 = vst [vmem:[#allocation2 + $0x10] sm:$0xf] %v1109_v58  ;;  %v1005_v52 = vld [vmem:[#allocation3 + $0x39] sm:$0x7f] }
 0x108   :  { %1134 = vst [vmem:[#allocation2 + $0x30] sm:$0xf] %v1133_v63  ;;  %1619 = vrot.lane.b32.xlu2 %v1579_v21, %s2008_s24  ;;  %1617 = vrot.lane.b32.xlu1 %v1578_v60, %s2008_s24  ;;  %v1096_v21 = vld [vmem:[#allocation2] sm:$0xf]  ;;  %v1567_v63 = vpack.c.bf16 %v1553_v55, %v1553_v55 }
 0x109   :  { %1125 = vst [vmem:[#allocation2 + $0x24] sm:$0xf] %v1124_v2  ;;  %1611 = vrot.lane.b32.xlu0 %v1575_v1, %s2008_s24  ;;  %v1558_v1 = vld [vmem:[#allocation3 + $0x31] sm:$0x7f] }
 0x10a   :  { %v1069_v16 = vpop.permute.xlu2 %1068  ;;  %v744_v13 = vpop.permute.xlu1 %743 }
 0x10b   :  { %v797_v20 = vsel %vm2307_vm0, %v744_v13, %v796_v14  ;;  %v742_v26 = vpop.permute.xlu0 %741  ;;  %v1029_v13 = vpack.c.bf16 %v1013_v0, %v1013_v0  ;;  %v1572_v14 = vpack.c.bf16 %v1558_v1, %v1558_v1 }
 0x10c   :  { %798 = vst [vmem:[#allocation2 + $0xc] sm:$0xf] %v797_v20  ;;  %v794_v11 = vsel %vm2307_vm0, %v742_v26, %v793_v27  ;;  %v1571_v20 = vpack.c.bf16 %v1557_v7, %v1557_v7 }
 0x10d   :  { %v1129_v5 = vld [vmem:[#allocation2 + $0x2c] sm:$0xf]  ;;  %795 = vst [vmem:[#allocation2 + $0x8] sm:$0xf] %v794_v11 }
 0x10e   :  { %v1162_v31 = vld [vmem:[#allocation2 + $0x10] sm:$0x1]  ;;  %v1130_v32 = vsel %vm2428_vm8, %v1069_v16, %v1129_v5 }
 0x10f   :  { %v1163_v33 = vsel %vm2447_vm10, 0, %v1162_v31  ;;  %v1183_v34 = vld [vmem:[#allocation2 + $0x30] sm:$0x1]  ;;  %1131 = vst [vmem:[#allocation2 + $0x2c] sm:$0xf] %v1130_v32 }
 0x110   :  { %1164 = vst [vmem:[#allocation2 + $0x10] sm:$0x1] %v1163_v33  ;;  %v1184_v35 = vsel %vm2447_vm10, 0, %v1183_v34  ;;  %v1174_v12 = vld [vmem:[#allocation2 + $0x24] sm:$0x1]  ;;  %1325 = vrot.lane.b32.xlu2 %v1248_v36, %s2006_s22  ;;  %1323 = vrot.lane.b32.xlu1 %v1241_v25, %s2006_s22 }
 0x111   :  { %1185 = vst [vmem:[#allocation2 + $0x30] sm:$0x1] %v1184_v35  ;;  %v1175_v22 = vsel %vm2447_vm10, 0, %v1174_v12  ;;  %897 = vrot.lane.b32.xlu0 %v858_v17, %s2003_s20  ;;  %v1566_v36 = vld [vmem:[#allocation3 + $0x79] sm:$0x7f] }
 0x112   :  { %1176 = vst [vmem:[#allocation2 + $0x24] sm:$0x1] %v1175_v22  ;;  %v1336_v41 = vpop.permute.xlu2 %1335  ;;  %v890_v42 = vpop.permute.xlu1 %889  ;;  %v1563_v25 = vld [vmem:[#allocation3 + $0x61] sm:$0x7f]  ;;  %v1562_v31 = vld [vmem:[#allocation3 + $0x59] sm:$0x7f]  ;;  %v1580_v37 = vpack.c.bf16 %v1566_v36, %v1566_v36 }
 0x113   :  { %935 = vst.msk [vmem:[#allocation2 + $0xc] sm:$0xf] %vm931_vm2, %v890_v42  ;;  %v888_v43 = vpop.permute.xlu0 %887  ;;  %v1384_v34 = vld [vmem:[#allocation2 + $0x20] sm:$0xf]  ;;  %v1577_v38 = vpack.c.bf16 %v1563_v25, %v1563_v25  ;;  %v1576_v42 = vpack.c.bf16 %v1562_v31, %v1562_v31 }
 0x114   :  { %934 = vst.msk [vmem:[#allocation2 + $0x8] sm:$0xf] %vm931_vm2, %v888_v43 }
 0x116   :  { %v1180_v49 = vld [vmem:[#allocation2 + $0x2c] sm:$0x1] }
 0x117   :  { %v1181_v50 = vsel %vm2447_vm10, 0, %v1180_v49 }
 0x118   :  { %1182 = vst [vmem:[#allocation2 + $0x2c] sm:$0x1] %v1181_v50  ;;  %1456 = vrot.lane.b32.xlu2 %v1425_v44, %s2007_s23  ;;  %1454 = vrot.lane.b32.xlu1 %v1424_v47, %s2007_s23  ;;  %v1399_v44 = vld [vmem:[#allocation2 + $0x34] sm:$0xf]  ;;  %v1555_v47 = vld [vmem:[#allocation3 + $0x19] sm:$0x7f] }
 0x119   :  { %v1387_v51 = vld [vmem:[#allocation2 + $0x24] sm:$0xf]  ;;  %1331 = vrot.lane.b32.xlu0 %v1269_v48, %s2006_s22  ;;  %v1375_v50 = vld [vmem:[#allocation2 + $0x10] sm:$0xf] }
 0x11a   :  { %v1388_v59 = vsel %vm2519_vm12, %v1336_v41, %v1387_v51  ;;  %v959_v29 = vld [vmem:[#allocation2 + $0xc] sm:$0x8]  ;;  %v2528_v54 = vpop.permute.xlu2 %1464  ;;  %v1049_v56 = vpop.permute.xlu1 %1048  ;;  %v1138_v41 = vld [vmem:[#allocation2 + $0x38] sm:$0xf]  ;;  %v1556_v48 = vld [vmem:[#allocation3 + $0x21] sm:$0x7f] }
 0x11b   :  { %1389 = vst [vmem:[#allocation2 + $0x24] sm:$0xf] %v1388_v59  ;;  %v960_v46 = vsel %vm2402_vm5, 0, %v959_v29  ;;  %v956_v3 = vld [vmem:[#allocation2 + $0x8] sm:$0x8]  ;;  %v1100_v57 = vsel %vm2428_vm8, %v1049_v56, %v1099_v9  ;;  %v1047_v58 = vpop.permute.xlu0 %1046 }
 0x11c   :  { %961 = vst [vmem:[#allocation2 + $0xc] sm:$0x8] %v960_v46  ;;  %v957_v60 = vsel %vm2402_vm5, 0, %v956_v3  ;;  %v1097_v61 = vsel %vm2428_vm8, %v1047_v58, %v1096_v21  ;;  %v1396_v9 = vld [vmem:[#allocation2 + $0x30] sm:$0xf]  ;;  %v1569_v21 = vpack.c.bf16 %v1555_v47, %v1555_v47  ;;  %v1570_v46 = vpack.c.bf16 %v1556_v48, %v1556_v48 }
 0x11d   :  { %958 = vst [vmem:[#allocation2 + $0x8] sm:$0x8] %v957_v60  ;;  %v1021_v58 = vpack.c.bf16 %v1005_v52, %v1005_v52  ;;  %v1767_v48 = vunpack.c.l.b16 %v1705_v19 }
 0x11e   :  { %1101 = vst [vmem:[#allocation2 + $0x4] sm:$0xf] %v1100_v57 }
 0x11f   :  { %1098 = vst [vmem:[#allocation2] sm:$0xf] %v1097_v61 }
 0x120   :  { %1597 = vrot.lane.b32.xlu2 %v1568_v62, %s2008_s24  ;;  %1595 = vrot.lane.b32.xlu1 %v1567_v63, %s2008_s24 }
 0x121   :  { %1462 = vrot.lane.b32.xlu0 %v858_v17, %s2007_s23  ;;  %v1114_v17 = vld [vmem:[#allocation2 + $0x18] sm:$0xf] }
 0x122   :  { %v2541_v2 = vpop.permute.xlu2 %1474  ;;  %v1067_v4 = vpop.permute.xlu1 %1066 }
 0x123   :  { %v1127_v8 = vsel %vm2428_vm8, %v1067_v4, %v1126_v6  ;;  %v1057_v15 = vpop.permute.xlu0 %1056  ;;  %v1559_v4 = vld [vmem:[#allocation3 + $0x39] sm:$0x7f] }
 0x124   :  { %1128 = vst [vmem:[#allocation2 + $0x28] sm:$0xf] %v1127_v8  ;;  %v1112_v16 = vsel %vm2428_vm8, %v1057_v15, %v1111_v23  ;;  %v1573_v6 = vpack.c.bf16 %v1559_v4, %v1559_v4  ;;  %v832_v23 = vld [vmem:[#allocation2 + $0x3c] sm:$0xf] }
 0x125   :  { %v1153_v18 = vld [vmem:[#allocation2 + $0x4] sm:$0x1]  ;;  %1113 = vst [vmem:[#allocation2 + $0x14] sm:$0xf] %v1112_v16 }
 0x126   :  { %v1154_v26 = vsel %vm2447_vm10, 0, %v1153_v18  ;;  %v1150_v27 = vld [vmem:[#allocation2] sm:$0x1] }
 0x127   :  { %1155 = vst [vmem:[#allocation2 + $0x4] sm:$0x1] %v1154_v26  ;;  %v1151_v11 = vsel %vm2447_vm10, 0, %v1150_v27  ;;  %v1102_v27 = vld [vmem:[#allocation2 + $0x8] sm:$0xf] }
 0x128   :  { %1152 = vst [vmem:[#allocation2] sm:$0x1] %v1151_v11  ;;  %1076 = vrot.lane.b32.xlu2 %v1029_v13, %s2004_s21  ;;  %1605 = vrot.lane.b32.xlu1 %v1572_v14, %s2008_s24  ;;  %v1105_v13 = vld [vmem:[#allocation2 + $0xc] sm:$0xf] }
 0x129   :  { %1603 = vrot.lane.b32.xlu0 %v1571_v20, %s2008_s24 }
 0x12a   :  { %v1059_v5 = vpop.permute.xlu2 %1058  ;;  %v1334_v10 = vpop.permute.xlu1 %1333 }
 0x12b   :  { %v1177_v32 = vld [vmem:[#allocation2 + $0x28] sm:$0x1]  ;;  %v1115_v33 = vsel %vm2428_vm8, %v1059_v5, %v1114_v17  ;;  %v1075_v35 = vpop.permute.xlu0 %1074  ;;  %v1385_v22 = vsel %vm2519_vm12, %v1334_v10, %v1384_v34  ;;  %v1393_v10 = vld [vmem:[#allocation2 + $0x2c] sm:$0xf] }
 0x12c   :  { %v1178_v12 = vsel %vm2447_vm10, 0, %v1177_v32  ;;  %v1165_v28 = vld [vmem:[#allocation2 + $0x14] sm:$0x1]  ;;  %1116 = vst [vmem:[#allocation2 + $0x18] sm:$0xf] %v1115_v33  ;;  %v1139_v43 = vsel %vm2428_vm8, %v1075_v35, %v1138_v41 }
 0x12d   :  { %1179 = vst [vmem:[#allocation2 + $0x28] sm:$0x1] %v1178_v12  ;;  %v1166_v40 = vsel %vm2447_vm10, 0, %v1165_v28 }
 0x12e   :  { %1167 = vst [vmem:[#allocation2 + $0x14] sm:$0x1] %v1166_v40  ;;  %v1366_v32 = vld [vmem:[#allocation2 + $0x4] sm:$0xf] }
 0x12f   :  { %1386 = vst [vmem:[#allocation2 + $0x20] sm:$0xf] %v1385_v22  ;;  %v1363_v28 = vld [vmem:[#allocation2] sm:$0xf] }
 0x130   :  { %1499 = vst.msk [vmem:[#allocation2 + $0x20] sm:$0xf] %vm1405_vm4, %v2528_v54  ;;  %1621 = vrot.lane.b32.xlu2 %v1580_v37, %s2008_s24  ;;  %1615 = vrot.lane.b32.xlu1 %v1577_v38, %s2008_s24 }
 0x131   :  { %1140 = vst [vmem:[#allocation2 + $0x38] sm:$0xf] %v1139_v43  ;;  %1613 = vrot.lane.b32.xlu0 %v1576_v42, %s2008_s24 }
 0x132   :  { %v1328_v49 = vpop.permute.xlu2 %1327  ;;  %v1344_v51 = vpop.permute.xlu1 %1343 }
 0x133   :  { %v1168_v55 = vld [vmem:[#allocation2 + $0x18] sm:$0x1]  ;;  %v1376_v59 = vsel %vm2519_vm12, %v1328_v49, %v1375_v50  ;;  %v1400_v29 = vsel %vm2519_vm12, %v1344_v51, %v1399_v44  ;;  %v1342_v54 = vpop.permute.xlu0 %1341  ;;  %v1772_v51 = vpack.c.b16 %v1767_v48, %v1767_v48 }
 0x134   :  { %v1169_v56 = vsel %vm2447_vm10, 0, %v1168_v55  ;;  %1377 = vst [vmem:[#allocation2 + $0x10] sm:$0xf] %v1376_v59  ;;  %v1397_v57 = vsel %vm2519_vm12, %v1342_v54, %v1396_v9 }
 0x135   :  { %1170 = vst [vmem:[#allocation2 + $0x18] sm:$0x1] %v1169_v56  ;;  %v1378_v44 = vld [vmem:[#allocation2 + $0x14] sm:$0xf]  ;;  %v1804_v54 = vsel %vm1802_vm15, %v1772_v51, 0  ;;  %v1944_v56 = vld [vmem:[%s2808_s1 + $0x18] sm:$0xff] }
 0x136   :  { %1401 = vst [vmem:[#allocation2 + $0x34] sm:$0xf] %v1400_v29  ;;  %1946 = vmatpush.bf16.msra.mxu2 %v1804_v54  ;;  %1947 = vmatpush.bf16.msra.mxu3 %v1804_v54 }
 0x137   :  { %v1532_v60 = vld [vmem:[#allocation2 + $0x20] sm:$0x8]  ;;  %1504 = vst.msk [vmem:[#allocation2 + $0x34] sm:$0xf] %vm1405_vm4, %v2541_v2  ;;  %1809 = vmatpush.bf16.msra.mxu0 %v1804_v54  ;;  %1945 = vmatpush.bf16.msra.mxu1 %v1804_v54 }
 0x138   :  { %v1533_v61 = vsel %vm2577_vm14, 0, %v1532_v60  ;;  %v1189_v62 = vld [vmem:[#allocation2 + $0x38] sm:$0x1]  ;;  %1398 = vst [vmem:[#allocation2 + $0x30] sm:$0xf] %v1397_v57  ;;  %1599 = vrot.lane.b32.xlu1 %v1569_v21, %s2008_s24  ;;  %1601 = vrot.lane.b32.xlu2 %v1570_v46, %s2008_s24 }
 0x139   :  { %1534 = vst [vmem:[#allocation2 + $0x20] sm:$0x8] %v1533_v61  ;;  %v1190_v63 = vsel %vm2447_vm10, 0, %v1189_v62  ;;  %1060 = vrot.lane.b32.xlu0 %v1021_v58, %s2004_s21  ;;  %v1943_v61 = vld [vmem:[%s2808_s1 + $0x10] sm:$0xff] }
 0x13a   :  { %1191 = vst [vmem:[#allocation2 + $0x38] sm:$0x1] %v1190_v63  ;;  %v1453_v0 = vpop.permute.xlu2 %1452  ;;  %v1473_v1 = vpop.permute.xlu1 %1472  ;;  %1949 = vmatpush.bf16.msra.mxu2 %v1944_v56  ;;  %1950 = vmatpush.bf16.msra.mxu3 %v1944_v56 }
 0x13b   :  { %1503 = vst.msk [vmem:[#allocation2 + $0x30] sm:$0xf] %vm1405_vm4, %v1473_v1  ;;  %v1467_v2 = vpop.permute.xlu0 %1466  ;;  %1810 = vmatpush.bf16.msra.mxu0 %v1944_v56  ;;  %1948 = vmatpush.bf16.msra.mxu1 %v1944_v56  ;;  %v1390_v1 = vld [vmem:[#allocation2 + $0x28] sm:$0xf] }
 0x13c   :  { %1500 = vst.msk [vmem:[#allocation2 + $0x24] sm:$0xf] %vm1405_vm4, %v1467_v2 }
 0x13e   :  { %v1547_v7 = vld [vmem:[#allocation2 + $0x34] sm:$0x8]  ;;  %1952 = vmatpush.bf16.msra.mxu2 %v1943_v61  ;;  %1953 = vmatpush.bf16.msra.mxu3 %v1943_v61 }
 0x13f   :  { %v1548_v8 = vsel %vm2577_vm14, 0, %v1547_v7  ;;  %1811 = vmatpush.bf16.msra.mxu0 %v1943_v61  ;;  %1951 = vmatpush.bf16.msra.mxu1 %v1943_v61 }
 0x140   :  { %1549 = vst [vmem:[#allocation2 + $0x34] sm:$0x8] %v1548_v8  ;;  %v1660_v59 = vld [vmem:[#allocation2 + $0x20] sm:$0xf]  ;;  %v1942_v8 = vld [vmem:[%s2808_s1 + $0x8] sm:$0xff] }
 0x141   :  { %1607 = vrot.lane.b32.xlu0 %v1573_v6, %s2008_s24 }
 0x142   :  { %v768_v15 = vpop.permute.xlu2 %767  ;;  %v1053_v16 = vpop.permute.xlu1 %1052  ;;  %v1544_v14 = vld [vmem:[#allocation2 + $0x30] sm:$0x8]  ;;  %1955 = vmatpush.bf16.msra.mxu2 %v1942_v8  ;;  %1956 = vmatpush.bf16.msra.mxu3 %v1942_v8 }
 0x143   :  { %v833_v18 = vsel %vm2307_vm0, %v768_v15, %v832_v23  ;;  %v1106_v20 = vsel %vm2428_vm8, %v1053_v16, %v1105_v13  ;;  %v1051_v26 = vpop.permute.xlu0 %1050  ;;  %v1535_v11 = vld [vmem:[#allocation2 + $0x24] sm:$0x8]  ;;  %v1545_v25 = vsel %vm2577_vm14, 0, %v1544_v14  ;;  %1812 = vmatpush.bf16.msra.mxu0 %v1942_v8  ;;  %1954 = vmatpush.bf16.msra.mxu1 %v1942_v8 }
 0x144   :  { %834 = vst [vmem:[#allocation2 + $0x3c] sm:$0xf] %v833_v18  ;;  %v1103_v36 = vsel %vm2428_vm8, %v1051_v26, %v1102_v27  ;;  %v1536_v5 = vsel %vm2577_vm14, 0, %v1535_v11  ;;  %v1941_v13 = vld [vmem:[%s2808_s1] sm:$0xff]  ;;  %v1402_v11 = vld [vmem:[#allocation2 + $0x38] sm:$0xf] }
 0x145   :  { %1107 = vst [vmem:[#allocation2 + $0xc] sm:$0xf] %v1106_v20 }
 0x146   :  { %1104 = vst [vmem:[#allocation2 + $0x8] sm:$0xf] %v1103_v36  ;;  %1958 = vmatpush.bf16.msra.mxu2 %v1941_v13  ;;  %1959 = vmatpush.bf16.msra.mxu3 %v1941_v13 }
 0x147   :  { %1546 = vst [vmem:[#allocation2 + $0x30] sm:$0x8] %v1545_v25  ;;  %v1675_v63 = vld [vmem:[#allocation2 + $0x34] sm:$0xf]  ;;  %1813 = vmatpush.bf16.msra.mxu0 %v1941_v13  ;;  %1957 = vmatpush.bf16.msra.mxu1 %v1941_v13 }
 0x148   :  { %1537 = vst [vmem:[#allocation2 + $0x24] sm:$0x8] %v1536_v5 }
 0x14a   :  { %v1340_v17 = vpop.permute.xlu2 %1339  ;;  %v1322_v31 = vpop.permute.xlu1 %1321 }
 0x14b   :  { %v1394_v33 = vsel %vm2519_vm12, %v1340_v17, %v1393_v10  ;;  %v1367_v34 = vsel %vm2519_vm12, %v1322_v31, %v1366_v32  ;;  %v1320_v35 = vpop.permute.xlu0 %1319  ;;  %v808_v31 = vld [vmem:[#allocation2 + $0x1c] sm:$0xf] }
 0x14c   :  { %v1159_v12 = vld [vmem:[#allocation2 + $0xc] sm:$0x1]  ;;  %1395 = vst [vmem:[#allocation2 + $0x2c] sm:$0xf] %v1394_v33  ;;  %v1364_v40 = vsel %vm2519_vm12, %v1320_v35, %v1363_v28 }
 0x14d   :  { %v1160_v22 = vsel %vm2447_vm10, 0, %v1159_v12  ;;  %v1156_v37 = vld [vmem:[#allocation2 + $0x8] sm:$0x1]  ;;  %1368 = vst [vmem:[#allocation2 + $0x4] sm:$0xf] %v1367_v34 }
 0x14e   :  { %1161 = vst [vmem:[#allocation2 + $0xc] sm:$0x1] %v1160_v22  ;;  %v1157_v38 = vsel %vm2447_vm10, 0, %v1156_v37  ;;  %v1672_v37 = vld [vmem:[#allocation2 + $0x30] sm:$0xf] }
 0x14f   :  { %1158 = vst [vmem:[#allocation2 + $0x8] sm:$0x1] %v1157_v38 }
 0x150   :  { %1493 = vst.msk [vmem:[#allocation2 + $0x4] sm:$0xf] %vm1405_vm4, %v1453_v0 }
 0x151   :  { %1365 = vst [vmem:[#allocation2] sm:$0xf] %v1364_v40 }
 0x152   :  { %v1471_v41 = vpop.permute.xlu2 %1470  ;;  %v1451_v42 = vpop.permute.xlu1 %1450 }
 0x153   :  { %1502 = vst.msk [vmem:[#allocation2 + $0x2c] sm:$0xf] %vm1405_vm4, %v1471_v41  ;;  %v1330_v43 = vpop.permute.xlu0 %1329 }
 0x154   :  { %1492 = vst.msk [vmem:[#allocation2] sm:$0xf] %vm1405_vm4, %v1451_v42  ;;  %v1379_v47 = vsel %vm2519_vm12, %v1330_v43, %v1378_v44  ;;  %v1663_v42 = vld [vmem:[#allocation2 + $0x24] sm:$0xf] }
 0x155   :  { %1380 = vst [vmem:[#allocation2 + $0x14] sm:$0xf] %v1379_v47  ;;  %v1372_v18 = vld [vmem:[#allocation2 + $0xc] sm:$0xf] }
 0x157   :  { %v1514_v49 = vld [vmem:[#allocation2 + $0x4] sm:$0x8] }
 0x158   :  { %v1515_v52 = vsel %vm2577_vm14, 0, %v1514_v49 }
 0x159   :  { %1516 = vst [vmem:[#allocation2 + $0x4] sm:$0x8] %v1515_v52 }
 0x15a   :  { %v1610_v55 = vpop.permute.xlu2 %1609  ;;  %v1461_v29 = vpop.permute.xlu1 %1460  ;;  %v1541_v57 = vld [vmem:[#allocation2 + $0x2c] sm:$0x8] }
 0x15b   :  { %v1661_v9 = vsel %vm2627_vm3, %v1610_v55, %v1660_v59  ;;  %1497 = vst.msk [vmem:[#allocation2 + $0x14] sm:$0xf] %vm1405_vm4, %v1461_v29  ;;  %v1459_v21 = vpop.permute.xlu0 %1458  ;;  %v1511_v46 = vld [vmem:[#allocation2] sm:$0x8]  ;;  %v1542_v60 = vsel %vm2577_vm14, 0, %v1541_v57 }
 0x15c   :  { %1662 = vst [vmem:[#allocation2 + $0x20] sm:$0xf] %v1661_v9  ;;  %v1512_v58 = vsel %vm2577_vm14, 0, %v1511_v46  ;;  %v1369_v59 = vld [vmem:[#allocation2 + $0x8] sm:$0xf] }
 0x15d   :  { %1496 = vst.msk [vmem:[#allocation2 + $0x10] sm:$0xf] %vm1405_vm4, %v1459_v21 }
 0x15e   :  { %1513 = vst [vmem:[#allocation2] sm:$0x8] %v1512_v58 }
 0x15f   :  { %1543 = vst [vmem:[#allocation2 + $0x2c] sm:$0x8] %v1542_v60  ;;  %v1381_v60 = vld [vmem:[#allocation2 + $0x18] sm:$0xf] }
 0x160   :  { %v1642_v28 = vld [vmem:[#allocation2 + $0x4] sm:$0xf] }
 0x162   :  { %v1620_v62 = vpop.permute.xlu2 %1619  ;;  %v1338_v0 = vpop.permute.xlu1 %1337  ;;  %v1526_v4 = vld [vmem:[#allocation2 + $0x14] sm:$0x8] }
 0x163   :  { %v1676_v2 = vsel %vm2627_vm3, %v1620_v62, %v1675_v63  ;;  %v1391_v6 = vsel %vm2519_vm12, %v1338_v0, %v1390_v1  ;;  %v914_v7 = vpop.permute.xlu0 %913  ;;  %v1527_v15 = vsel %vm2577_vm14, 0, %v1526_v4 }
 0x164   :  { %1677 = vst [vmem:[#allocation2 + $0x34] sm:$0xf] %v1676_v2  ;;  %v1523_v23 = vld [vmem:[#allocation2 + $0x10] sm:$0x8] }
 0x165   :  { %1392 = vst [vmem:[#allocation2 + $0x28] sm:$0xf] %v1391_v6  ;;  %v1524_v16 = vsel %vm2577_vm14, 0, %v1523_v23  ;;  %v1639_v4 = vld [vmem:[#allocation2] sm:$0xf] }
 0x166   :  { %947 = vst.msk [vmem:[#allocation2 + $0x3c] sm:$0xf] %vm931_vm2, %v914_v7 }
 0x167   :  { %1528 = vst [vmem:[#allocation2 + $0x14] sm:$0x8] %v1527_v15 }
 0x168   :  { %1525 = vst [vmem:[#allocation2 + $0x10] sm:$0x8] %v1524_v16 }
 0x16a   :  { %v1326_v14 = vpop.permute.xlu2 %1325  ;;  %v1469_v20 = vpop.permute.xlu1 %1468 }
 0x16b   :  { %v1373_v26 = vsel %vm2519_vm12, %v1326_v14, %v1372_v18  ;;  %1501 = vst.msk [vmem:[#allocation2 + $0x28] sm:$0xf] %vm1405_vm4, %v1469_v20  ;;  %v1346_v27 = vpop.permute.xlu0 %1345 }
 0x16c   :  { %1374 = vst [vmem:[#allocation2 + $0xc] sm:$0xf] %v1373_v26  ;;  %v1403_v36 = vsel %vm2519_vm12, %v1346_v27, %v1402_v11 }
 0x16d   :  { %1404 = vst [vmem:[#allocation2 + $0x38] sm:$0xf] %v1403_v36  ;;  %v995_v25 = vld [vmem:[#allocation2 + $0x3c] sm:$0x8] }
 0x16e   :  { %v996_v5 = vsel %vm2402_vm5, 0, %v995_v25  ;;  %v1654_v16 = vld [vmem:[#allocation2 + $0x14] sm:$0xf]  ;;  %v1669_v25 = vld [vmem:[#allocation2 + $0x2c] sm:$0xf] }
 0x16f   :  { %997 = vst [vmem:[#allocation2 + $0x3c] sm:$0x8] %v996_v5  ;;  %v1651_v18 = vld [vmem:[#allocation2 + $0x10] sm:$0xf] }
 0x172   :  { %v1457_v17 = vpop.permute.xlu2 %1456  ;;  %v752_v10 = vpop.permute.xlu1 %751  ;;  %v1538_v32 = vld [vmem:[#allocation2 + $0x28] sm:$0x8] }
 0x173   :  { %1495 = vst.msk [vmem:[#allocation2 + $0xc] sm:$0xf] %vm1405_vm4, %v1457_v17  ;;  %v809_v33 = vsel %vm2307_vm0, %v752_v10, %v808_v31  ;;  %v1477_v34 = vpop.permute.xlu0 %1476  ;;  %v1539_v35 = vsel %vm2577_vm14, 0, %v1538_v32  ;;  %vm1855_vm0 = vcmask 130048  }
 0x174   :  { %810 = vst [vmem:[#allocation2 + $0x1c] sm:$0xf] %v809_v33 }
 0x175   :  { %1505 = vst.msk [vmem:[#allocation2 + $0x38] sm:$0xf] %vm1405_vm4, %v1477_v34 }
 0x176   :  { %1540 = vst [vmem:[#allocation2 + $0x28] sm:$0x8] %v1539_v35  ;;  %v1141_v49 = vld [vmem:[#allocation2 + $0x3c] sm:$0xf] }
 0x17a   :  { %v1598_v12 = vpop.permute.xlu2 %1597  ;;  %v1618_v22 = vpop.permute.xlu1 %1617  ;;  %v1520_v38 = vld [vmem:[#allocation2 + $0xc] sm:$0x8] }
 0x17b   :  { %v1643_v40 = vsel %vm2627_vm3, %v1598_v12, %v1642_v28  ;;  %v1673_v39 = vsel %vm2627_vm3, %v1618_v22, %v1672_v37  ;;  %v1612_v41 = vpop.permute.xlu0 %1611  ;;  %v1521_v19 = vsel %vm2577_vm14, 0, %v1520_v38 }
 0x17c   :  { %1644 = vst [vmem:[#allocation2 + $0x4] sm:$0xf] %v1643_v40  ;;  %v1664_v43 = vsel %vm2627_vm3, %v1612_v41, %v1663_v42  ;;  %v1550_v44 = vld [vmem:[#allocation2 + $0x38] sm:$0x8]  ;;  %v1971_v41 = vld [vmem:[%s2809_s2] ss:$0 sm:$0xff] }
 0x17d   :  { %1674 = vst [vmem:[#allocation2 + $0x30] sm:$0xf] %v1673_v39  ;;  %v1551_v47 = vsel %vm2577_vm14, 0, %v1550_v44  ;;  %v1666_v10 = vld [vmem:[#allocation2 + $0x28] sm:$0xf] }
 0x17e   :  { %1665 = vst [vmem:[#allocation2 + $0x24] sm:$0xf] %v1664_v43 }
 0x17f   :  { %1552 = vst [vmem:[#allocation2 + $0x38] sm:$0x8] %v1551_v47 }
 0x180   :  { %1522 = vst [vmem:[#allocation2 + $0xc] sm:$0x8] %v1521_v19 }
 0x182   :  { %v1077_v48 = vpop.permute.xlu2 %1076  ;;  %v1324_v51 = vpop.permute.xlu1 %1323 }
 0x183   :  { %v1142_v52 = vsel %vm2428_vm8, %v1077_v48, %v1141_v49  ;;  %v898_v55 = vpop.permute.xlu0 %897  ;;  %v1370_v54 = vsel %vm2519_vm12, %v1324_v51, %v1369_v59 }
 0x184   :  { %1143 = vst [vmem:[#allocation2 + $0x3c] sm:$0xf] %v1142_v52  ;;  %v1939_v29 = vld [vmem:[#allocation2 + $0x30] sm:$0xff] }
 0x185   :  { %1147 = vst.msk [vmem:[#allocation2 + $0x3c] sm:$0xf] %vm1145_vm1, %v2005_v24  ;;  %v1937_v56 = vld [vmem:[#allocation2 + $0x20] sm:$0xff]  ;;  %1931 = vmatmul.msk.bf16.vlgmr.msra.gmra.mxu3 %vm1777_vm11, %v1939_v29 }
 0x186   :  { %1407 = vst.msk [vmem:[#allocation2 + $0x3c] sm:$0xf] %vm1405_vm4, %v2005_v24  ;;  %1929 = vmatmul.msk.bf16.vlgmr.msra.gmra.mxu2 %vm1777_vm11, %v1937_v56  ;;  %v1678_v21 = vld [vmem:[#allocation2 + $0x38] sm:$0xf] }
 0x187   :  { %1508 = vst.msk [vmem:[#allocation2 + $0x3c] sm:$0xf] %vm1506_vm7, %v2005_v24  ;;  %v1648_v62 = vld [vmem:[#allocation2 + $0xc] sm:$0xf] }
 0x188   :  { %1371 = vst [vmem:[#allocation2 + $0x8] sm:$0xf] %v1370_v54 }
 0x189   :  { %939 = vst.msk [vmem:[#allocation2 + $0x1c] sm:$0xf] %vm931_vm2, %v898_v55 }
 0x18a   :  { %v1622_v9 = vpop.permute.xlu2 %1621  ;;  %v1455_v46 = vpop.permute.xlu1 %1454 }
 0x18b   :  { %v1679_v57 = vsel %vm2627_vm3, %v1622_v9, %v1678_v21  ;;  %1494 = vst.msk [vmem:[#allocation2 + $0x8] sm:$0xf] %vm1405_vm4, %v1455_v46  ;;  %v1332_v58 = vpop.permute.xlu0 %1331 }
 0x18c   :  { %1680 = vst [vmem:[#allocation2 + $0x38] sm:$0xf] %v1679_v57  ;;  %v1382_v61 = vsel %vm2519_vm12, %v1332_v58, %v1381_v60 }
 0x18d   :  { %1383 = vst [vmem:[#allocation2 + $0x18] sm:$0xf] %v1382_v61 }
 0x190   :  { %v971_v63 = vld [vmem:[#allocation2 + $0x1c] sm:$0x8] }
 0x191   :  { %v972_v0 = vsel %vm2402_vm5, 0, %v971_v63 }
 0x192   :  { %v1596_v1 = vpop.permute.xlu1 %1595  ;;  %v1602_v2 = vpop.permute.xlu2 %1601  ;;  %v1517_v6 = vld [vmem:[#allocation2 + $0x8] sm:$0x8]  ;;  %973 = vst [vmem:[#allocation2 + $0x1c] sm:$0x8] %v972_v0 }
 0x193   :  { %v1640_v7 = vsel %vm2627_vm3, %v1596_v1, %v1639_v4  ;;  %v1463_v8 = vpop.permute.xlu0 %1462  ;;  %v1940_v15 = vld [vmem:[#allocation2 + $0x38] sm:$0xff]  ;;  %v1649_v45 = vsel %vm2627_vm3, %v1602_v2, %v1648_v62  ;;  %v1518_v23 = vsel %vm2577_vm14, 0, %v1517_v6 }
 0x194   :  { %1641 = vst [vmem:[#allocation2] sm:$0xf] %v1640_v7 }
 0x195   :  { %1498 = vst.msk [vmem:[#allocation2 + $0x18] sm:$0xf] %vm1405_vm4, %v1463_v8  ;;  %1932 = vmatmul.msk.bf16.gmra.mxu3 %vm1777_vm11, %v1940_v15 }
 0x196   :  { %1650 = vst [vmem:[#allocation2 + $0xc] sm:$0xf] %v1649_v45 }
 0x197   :  { %1519 = vst [vmem:[#allocation2 + $0x8] sm:$0x8] %v1518_v23 }
 0x199   :  { %v1117_v12 = vld [vmem:[#allocation2 + $0x1c] sm:$0xf] }
 0x19a   :  { %v1606_v53 = vpop.permute.xlu1 %1605 }
 0x19b   :  { %v1655_v13 = vsel %vm2627_vm3, %v1606_v53, %v1654_v16  ;;  %v1604_v14 = vpop.permute.xlu0 %1603  ;;  %v1933_v20 = vld [vmem:[#allocation2] sm:$0xff] }
 0x19c   :  { %1656 = vst [vmem:[#allocation2 + $0x14] sm:$0xf] %v1655_v13  ;;  %v1652_v26 = vsel %vm2627_vm3, %v1604_v14, %v1651_v18  ;;  %v1529_v27 = vld [vmem:[#allocation2 + $0x18] sm:$0x8]  ;;  %1925 = vmatmul.msk.bf16.vlgmr.msra.gmra.mxu0 %vm1777_vm11, %v1933_v20 }
 0x19d   :  { %1653 = vst [vmem:[#allocation2 + $0x10] sm:$0xf] %v1652_v26  ;;  %v1530_v11 = vsel %vm2577_vm14, 0, %v1529_v27 }
 0x19e   :  { %1531 = vst [vmem:[#allocation2 + $0x18] sm:$0x8] %v1530_v11  ;;  %v1645_v34 = vld [vmem:[#allocation2 + $0x8] sm:$0xf] }
 0x1a2   :  { %v1616_v36 = vpop.permute.xlu1 %1615 }
 0x1a3   :  { %v1670_v5 = vsel %vm2627_vm3, %v1616_v36, %v1669_v25  ;;  %v1614_v17 = vpop.permute.xlu0 %1613 }
 0x1a4   :  { %1671 = vst [vmem:[#allocation2 + $0x2c] sm:$0xf] %v1670_v5  ;;  %v1667_v31 = vsel %vm2627_vm3, %v1614_v17, %v1666_v10  ;;  %v1935_v32 = vld [vmem:[#allocation2 + $0x10] sm:$0xff] }
 0x1a5   :  { %1668 = vst [vmem:[#allocation2 + $0x28] sm:$0xf] %v1667_v31  ;;  %1927 = vmatmul.msk.bf16.vlgmr.msra.gmra.mxu1 %vm1777_vm11, %v1935_v32  ;;  %v1657_v38 = vld [vmem:[#allocation2 + $0x18] sm:$0xf] }
 0x1aa   :  { %v1600_v33 = vpop.permute.xlu1 %1599 }
 0x1ab   :  { %v1646_v3 = vsel %vm2627_vm3, %v1600_v33, %v1645_v34  ;;  %v1061_v35 = vpop.permute.xlu0 %1060 }
 0x1ac   :  { %1647 = vst [vmem:[#allocation2 + $0x8] sm:$0xf] %v1646_v3  ;;  %v1118_v28 = vsel %vm2428_vm8, %v1061_v35, %v1117_v12  ;;  %v1938_v22 = vld [vmem:[#allocation2 + $0x28] sm:$0xff] }
 0x1ad   :  { %1119 = vst [vmem:[#allocation2 + $0x1c] sm:$0xf] %v1118_v28  ;;  %1930 = vmatmul.msk.bf16.gmra.mxu2 %vm1777_vm11, %v1938_v22 }
 0x1ae   :  { %1146 = vst.msk [vmem:[#allocation2 + $0x1c] sm:$0xf] %vm1145_vm1, %v2005_v24 }
 0x1af   :  { %1406 = vst.msk [vmem:[#allocation2 + $0x1c] sm:$0xf] %vm1405_vm4, %v2005_v24 }
 0x1b0   :  { %1507 = vst.msk [vmem:[#allocation2 + $0x1c] sm:$0xf] %vm1506_vm7, %v2005_v24 }
 0x1b3   :  { %v1608_v37 = vpop.permute.xlu0 %1607  ;;  %v1934_v40 = vld [vmem:[#allocation2 + $0x8] sm:$0xff] }
 0x1b4   :  { %v1658_v30 = vsel %vm2627_vm3, %v1608_v37, %v1657_v38  ;;  %1926 = vmatmul.msk.bf16.gmra.mxu0 %vm1777_vm11, %v1934_v40 }
 0x1b5   :  { %1659 = vst [vmem:[#allocation2 + $0x18] sm:$0xf] %v1658_v30 }
 0x1bc   :  { %v1936_v39 = vld [vmem:[#allocation2 + $0x18] sm:$0xff] }
 0x1bd   :  { %1928 = vmatmul.msk.bf16.gmra.mxu1 %vm1777_vm11, %v1936_v39 }
 0x208   :  { %v1845_v42 = vpop.f32.mrf.mxu3 }
 0x209   :  { %v1835_v43 = vpop.f32.mrf.mxu2  ;;  %v1846_v24 = vadd.f32 %v1971_v41, %v1845_v42 }
 0x20a   :  { %v1836_v44 = vadd.f32 %v1971_v41, %v1835_v43 }
 0x20b   :  { %1868 = vst.msk [vmem:[%s2810_s3 + $0x60] sm:$0xff] %vm1855_vm0, %v1846_v24 }
 0x20c   :  { %1864 = vst.msk [vmem:[%s2810_s3 + $0x40] sm:$0xff] %vm1855_vm0, %v1836_v44 }
 0x210   :  { %v1847_v50 = vpop.f32.mrf.mxu3 }
 0x211   :  { %v1837_v47 = vpop.f32.mrf.mxu2  ;;  %v1848_v19 = vadd.f32 %v1971_v41, %v1847_v50 }
 0x212   :  { %v1838_v48 = vadd.f32 %v1971_v41, %v1837_v47 }
 0x213   :  { %1869 = vst.msk [vmem:[%s2810_s3 + $0x68] sm:$0xff] %vm1855_vm0, %v1848_v19 }
 0x214   :  { %1865 = vst.msk [vmem:[%s2810_s3 + $0x48] sm:$0xff] %vm1855_vm0, %v1838_v48 }
 0x218   :  { %v1850_v49 = vpop.f32.mrf.mxu3 }
 0x219   :  { %v1851_v51 = vadd.f32 %v1971_v41, %v1850_v49  ;;  %v1815_v52 = vpop.f32.mrf.mxu0 }
 0x21a   :  { %v1816_v55 = vadd.f32 %v1971_v41, %v1815_v52 }
 0x21b   :  { %1870 = vst.msk [vmem:[%s2810_s3 + $0x70] sm:$0xff] %vm1855_vm0, %v1851_v51 }
 0x21c   :  { %1856 = vst.msk [vmem:[%s2810_s3] sm:$0xff] %vm1855_vm0, %v1816_v55 }
 0x220   :  { %v1852_v59 = vpop.f32.mrf.mxu3 }
 0x221   :  { %v1853_v29 = vadd.f32 %v1971_v41, %v1852_v59  ;;  %v1817_v54 = vpop.f32.mrf.mxu0 }
 0x222   :  { %v1818_v56 = vadd.f32 %v1971_v41, %v1817_v54  ;;  %v1825_v9 = vpop.f32.mrf.mxu1 }
 0x223   :  { %1871 = vst.msk [vmem:[%s2810_s3 + $0x78] sm:$0xff] %vm1855_vm0, %v1853_v29  ;;  %v1826_v21 = vadd.f32 %v1971_v41, %v1825_v9 }
 0x224   :  { %1857 = vst.msk [vmem:[%s2810_s3 + $0x8] sm:$0xff] %vm1855_vm0, %v1818_v56 }
 0x225   :  { %1860 = vst.msk [vmem:[%s2810_s3 + $0x20] sm:$0xff] %vm1855_vm0, %v1826_v21 }
 0x22a   :  { %v1827_v46 = vpop.f32.mrf.mxu1 }
 0x22b   :  { %v1828_v57 = vadd.f32 %v1971_v41, %v1827_v46 }
 0x22d   :  { %1861 = vst.msk [vmem:[%s2810_s3 + $0x28] sm:$0xff] %vm1855_vm0, %v1828_v57 }
 0x230   :  { %v1840_v58 = vpop.f32.mrf.mxu2 }
 0x231   :  { %v1841_v60 = vadd.f32 %v1971_v41, %v1840_v58  ;;  %v1820_v61 = vpop.f32.mrf.mxu0 }
 0x232   :  { %v1821_v62 = vadd.f32 %v1971_v41, %v1820_v61 }
 0x233   :  { %1866 = vst.msk [vmem:[%s2810_s3 + $0x50] sm:$0xff] %vm1855_vm0, %v1841_v60 }
 0x234   :  { %1858 = vst.msk [vmem:[%s2810_s3 + $0x10] sm:$0xff] %vm1855_vm0, %v1821_v62 }
 0x238   :  { %v1842_v63 = vpop.f32.mrf.mxu2 }
 0x239   :  { %v1843_v0 = vadd.f32 %v1971_v41, %v1842_v63  ;;  %v1822_v1 = vpop.f32.mrf.mxu0 }
 0x23a   :  { %v1823_v4 = vadd.f32 %v1971_v41, %v1822_v1  ;;  %v1830_v2 = vpop.f32.mrf.mxu1 }
 0x23b   :  { %1867 = vst.msk [vmem:[%s2810_s3 + $0x58] sm:$0xff] %vm1855_vm0, %v1843_v0  ;;  %v1831_v6 = vadd.f32 %v1971_v41, %v1830_v2 }
 0x23c   :  { %1859 = vst.msk [vmem:[%s2810_s3 + $0x18] sm:$0xff] %vm1855_vm0, %v1823_v4 }
 0x23d   :  { %1862 = vst.msk [vmem:[%s2810_s3 + $0x30] sm:$0xff] %vm1855_vm0, %v1831_v6 }
 0x242   :  { %v1832_v7 = vpop.f32.mrf.mxu1 }
 0x243   :  { %v1833_v8 = vadd.f32 %v1971_v41, %v1832_v7 }
 0x245   :  { %1863 = vst.msk [vmem:[%s2810_s3 + $0x38] sm:$0xff] %vm1855_vm0, %v1833_v8 }
 0x246   :  { %1876 = vsyncpa [#allocation4], 1 }

</bundles_post_ra>
